<compile_context>
chip_gen: v7x
topology: tpu7x:2x2x1
jax: 0.10.0
libtpu: 0.0.40
codegen_flags: <defaults>
</compile_context>

<pallas_src>
import functools

import jax
import jax.numpy as jnp
from jax.experimental import pallas as pl
from jax.experimental.pallas import tpu as pltpu


# ------------------------------ Pallas kernel -------------------------------

def _encoder_fused_kernel(xr_ref, convw_ref, convb_ref, fcw_ref, fcb_ref, o_ref,
                          *, Wp):
    # xr_ref   : (C, B, Lp)      f32, VMEM  padded image, rows flattened to lanes
    # convw_ref: (OC*C*9,)       f32, SMEM  PyTorch (oc, c, kh, kw) order
    # convb_ref: (OC,)           f32, SMEM
    # fcw_ref  : (OC, L, E)      bf16, VMEM row h*Wp+w = fc row oc*H*W+h*W+w,
    #                                       zero rows for pad/garbage columns
    # fcb_ref  : (1, E)          f32, VMEM
    # o_ref    : (B, E)          f32, VMEM  lane-dense output
    C, B, Lp = xr_ref.shape
    OC, L, E = fcw_ref.shape

    # ---- Conv2d(C->OC, 3x3, pad=1) as 9*C lane-shifted FMAs per oc ---------
    # Output position o = h*Wp + w reads input position o + dh*Wp + dw; each
    # shifted (B, L) patch is loaded once and shared by both output channels.
    acc = [jnp.zeros((B, L), jnp.float32) for _ in range(OC)]
    for c in range(C):
        for dh in range(3):
            for dw in range(3):
                s = dh * Wp + dw
                patch = xr_ref[c, :, pl.ds(s, L)]               # (B, L)
                for oc in range(OC):
                    wk = convw_ref[(oc * C + c) * 9 + dh * 3 + dw]
                    acc[oc] = acc[oc] + patch * wk

    # ---- fc: one big-K (B,L)@(L,E) MXU dot per output channel --------------
    # (the channel-major flatten is implicit in fcw_ref's row indexing; the
    #  garbage lane positions hit exact-zero weight rows)
    out = jnp.zeros((B, E), jnp.float32)
    for oc in range(OC):
        feat = jnp.maximum(acc[oc] + convb_ref[oc], 0.0)        # conv ReLU (f32)
        out = out + jnp.dot(feat.astype(jnp.bfloat16), fcw_ref[oc],
                            preferred_element_type=jnp.float32)

    o_ref[...] = jnp.maximum(out + fcb_ref[...], 0.0)           # fc bias + ReLU


# -------------------------------- wrapper ------------------------------------

def encoder_forward(x, params):
    """Pallas implementation of Encoder.forward; returns (B, embedding_dim)."""
    B, C, H, W = x.shape
    OC = params["conv_w"].shape[0]                # = 2
    E = params["fc_b"].shape[-1]
    Hp, Wp = H + 2, W + 2

    # K of the fc dots: covers every strided conv-output position h*Wp + w,
    # rounded up to a multiple of 128 for full-width MXU passes (483 -> 512).
    L = ((H * Wp + 127) // 128) * 128
    # Flat padded-input length: shifted reads go up to L-1 + 2*Wp + 2 (560->640).
    Lp = ((L + 2 * Wp + 2 + 127) // 128) * 128

    # Trace-time layout plumbing only (no compute hoisted out of the kernel):
    xpad = jnp.pad(x, ((0, 0), (0, 0), (1, 1), (1, 1)))          # (B, C, Hp, Wp)
    xr = jnp.transpose(xpad, (1, 0, 2, 3)).reshape(C, B, Hp * Wp)
    xr = jnp.pad(xr, ((0, 0), (0, 0), (0, Lp - Hp * Wp)))        # (C, B, Lp)

    # fc_w row oc*H*W + h*W + w  ->  fcw[oc, h*Wp + w, :]; pad/garbage lane
    # columns get exact-zero rows (and stay exactly zero after the bf16 cast).
    fcw = params["fc_w"].reshape(OC, H, W, E)
    fcw = jnp.pad(fcw, ((0, 0), (0, 0), (0, Wp - W), (0, 0)))    # (OC, H, Wp, E)
    fcw = fcw.reshape(OC, H * Wp, E)
    fcw = jnp.pad(fcw, ((0, 0), (0, L - H * Wp), (0, 0)))        # (OC, L, E)
    fcw = fcw.astype(jnp.bfloat16)                               # bf16 MXU operand

    conv_w_flat = params["conv_w"].reshape(-1)                   # (OC*C*9,)
    fcb_r = params["fc_b"].reshape(1, E)

    kernel = functools.partial(_encoder_fused_kernel, Wp=Wp)
    return pl.pallas_call(
        kernel,
        out_shape=jax.ShapeDtypeStruct((B, E), jnp.float32),
        in_specs=[
            pl.BlockSpec(memory_space=pltpu.MemorySpace.VMEM),   # padded input
            pl.BlockSpec(memory_space=pltpu.MemorySpace.SMEM),   # conv weights
            pl.BlockSpec(memory_space=pltpu.MemorySpace.SMEM),   # conv bias
            pl.BlockSpec(memory_space=pltpu.MemorySpace.VMEM),   # fc weights bf16
            pl.BlockSpec(memory_space=pltpu.MemorySpace.VMEM),   # fc bias
        ],
        out_specs=pl.BlockSpec(memory_space=pltpu.MemorySpace.VMEM),
    )(xr, conv_w_flat, params["conv_b"], fcw, fcb_r)


# ------------------------- pure-JAX reference (check) ------------------------

def encoder_reference(x, params):
    B = x.shape[0]
    E = params["fc_b"].shape[-1]
    conv = jax.lax.conv_general_dilated(
        x, params["conv_w"], window_strides=(1, 1), padding=((1, 1), (1, 1)),
        dimension_numbers=("NCHW", "OIHW", "NCHW"))
    conv = jnp.maximum(conv + params["conv_b"].reshape(1, -1, 1, 1), 0.0)
    flat = conv.reshape(B, -1)                             # channel-major flatten
    return jnp.maximum(flat @ params["fc_w"] + params["fc_b"].reshape(1, E), 0.0)


# ---------------------------- deterministic params ---------------------------

def init_params(key, input_channels, H, W, embedding_dim):
    flattened = 2 * H * W
    ks = jax.random.split(key, 4)

    def winit(k, shape, fan_in):
        return jax.random.normal(k, shape, jnp.float32) / jnp.sqrt(fan_in)

    return {
        # conv: PyTorch layout (out_c=2, in_c, 3, 3)
        "conv_w": winit(ks[0], (2, input_channels, 3, 3), input_channels * 9),
        "conv_b": winit(ks[1], (2,), input_channels * 9),
        # fc stored (in, out) with in-index following the channel-major flatten
        "fc_w": winit(ks[2], (flattened, embedding_dim), flattened),
        "fc_b": winit(ks[3], (embedding_dim,), flattened),
    }


# ------------------------------------ main -----------------------------------

if __name__ == "__main__":
    # Encoder defaults: input_channels=3, 21x21 inputs, embedding_dim=128.
    B, C, H, W = 2, 3, 21, 21
    embedding_dim = 128

    key = jax.random.PRNGKey(0)
    kx, kp = jax.random.split(key)
    x = jax.random.normal(kx, (B, C, H, W), jnp.float32)
    params = init_params(kp, C, H, W, embedding_dim)

    out = jax.block_until_ready(jax.jit(encoder_forward)(x, params))
    ref = jax.block_until_ready(jax.jit(encoder_reference)(x, params))

    assert out.shape == (B, embedding_dim)
    assert bool(jnp.all(jnp.isfinite(out)))
    # Tolerance covers the bf16 MXU operands (f32 accumulation, K=512 per oc).
    assert bool(jnp.allclose(out, ref, atol=1e-2, rtol=1e-2))
    print("KERNEL_OK")
</pallas_src>

<mosaic_0001>
module attributes {stable_mosaic.version = 11 : i64} {
  func.func @_encoder_fused_kernel(%arg0: memref<3x2x640xf32, #tpu.memory_space<vmem>>, %arg1: memref<54xf32, #tpu.memory_space<smem>>, %arg2: memref<2xf32, #tpu.memory_space<smem>>, %arg3: memref<2x512x128xbf16, #tpu.memory_space<vmem>>, %arg4: memref<1x128xf32, #tpu.memory_space<vmem>>, %arg5: memref<2x128xf32, #tpu.memory_space<vmem>>) attributes {dimension_semantics = [], scalar_prefetch = 0 : i64, scratch_operands = 0 : i64, tpu.core_type = #tpu.core_type<tc>} {
    %cst = arith.constant 0.000000e+00 : f32
    %0 = vector.broadcast %cst : f32 to vector<2x512xf32>
    %cst_0 = arith.constant 0.000000e+00 : f32
    %1 = vector.broadcast %cst_0 : f32 to vector<2x512xf32>
    %c0 = arith.constant 0 : index
    %c0_1 = arith.constant 0 : index
    %c0_2 = arith.constant 0 : index
    %2 = vector.load %arg0[%c0, %c0_1, %c0_2] : memref<3x2x640xf32, #tpu.memory_space<vmem>>, vector<1x2x512xf32>
    %3 = vector.shape_cast %2 : vector<1x2x512xf32> to vector<2x512xf32>
    %c0_3 = arith.constant 0 : index
    %4 = memref.load %arg1[%c0_3] : memref<54xf32, #tpu.memory_space<smem>>
    %5 = vector.broadcast %4 : f32 to vector<2x512xf32>
    %6 = arith.mulf %3, %5 : vector<2x512xf32>
    %7 = arith.addf %0, %6 : vector<2x512xf32>
    %c27 = arith.constant 27 : index
    %8 = memref.load %arg1[%c27] : memref<54xf32, #tpu.memory_space<smem>>
    %9 = vector.broadcast %8 : f32 to vector<2x512xf32>
    %10 = arith.mulf %3, %9 : vector<2x512xf32>
    %11 = arith.addf %1, %10 : vector<2x512xf32>
    %c0_4 = arith.constant 0 : index
    %c0_5 = arith.constant 0 : index
    %c1 = arith.constant 1 : index
    %12 = vector.load %arg0[%c0_4, %c0_5, %c1] : memref<3x2x640xf32, #tpu.memory_space<vmem>>, vector<1x2x512xf32>
    %13 = vector.shape_cast %12 : vector<1x2x512xf32> to vector<2x512xf32>
    %c1_6 = arith.constant 1 : index
    %14 = memref.load %arg1[%c1_6] : memref<54xf32, #tpu.memory_space<smem>>
    %15 = vector.broadcast %14 : f32 to vector<2x512xf32>
    %16 = arith.mulf %13, %15 : vector<2x512xf32>
    %17 = arith.addf %7, %16 : vector<2x512xf32>
    %c28 = arith.constant 28 : index
    %18 = memref.load %arg1[%c28] : memref<54xf32, #tpu.memory_space<smem>>
    %19 = vector.broadcast %18 : f32 to vector<2x512xf32>
    %20 = arith.mulf %13, %19 : vector<2x512xf32>
    %21 = arith.addf %11, %20 : vector<2x512xf32>
    %c0_7 = arith.constant 0 : index
    %c0_8 = arith.constant 0 : index
    %c2 = arith.constant 2 : index
    %22 = vector.load %arg0[%c0_7, %c0_8, %c2] : memref<3x2x640xf32, #tpu.memory_space<vmem>>, vector<1x2x512xf32>
    %23 = vector.shape_cast %22 : vector<1x2x512xf32> to vector<2x512xf32>
    %c2_9 = arith.constant 2 : index
    %24 = memref.load %arg1[%c2_9] : memref<54xf32, #tpu.memory_space<smem>>
    %25 = vector.broadcast %24 : f32 to vector<2x512xf32>
    %26 = arith.mulf %23, %25 : vector<2x512xf32>
    %27 = arith.addf %17, %26 : vector<2x512xf32>
    %c29 = arith.constant 29 : index
    %28 = memref.load %arg1[%c29] : memref<54xf32, #tpu.memory_space<smem>>
    %29 = vector.broadcast %28 : f32 to vector<2x512xf32>
    %30 = arith.mulf %23, %29 : vector<2x512xf32>
    %31 = arith.addf %21, %30 : vector<2x512xf32>
    %c0_10 = arith.constant 0 : index
    %c0_11 = arith.constant 0 : index
    %c23 = arith.constant 23 : index
    %32 = vector.load %arg0[%c0_10, %c0_11, %c23] : memref<3x2x640xf32, #tpu.memory_space<vmem>>, vector<1x2x512xf32>
    %33 = vector.shape_cast %32 : vector<1x2x512xf32> to vector<2x512xf32>
    %c3 = arith.constant 3 : index
    %34 = memref.load %arg1[%c3] : memref<54xf32, #tpu.memory_space<smem>>
    %35 = vector.broadcast %34 : f32 to vector<2x512xf32>
    %36 = arith.mulf %33, %35 : vector<2x512xf32>
    %37 = arith.addf %27, %36 : vector<2x512xf32>
    %c30 = arith.constant 30 : index
    %38 = memref.load %arg1[%c30] : memref<54xf32, #tpu.memory_space<smem>>
    %39 = vector.broadcast %38 : f32 to vector<2x512xf32>
    %40 = arith.mulf %33, %39 : vector<2x512xf32>
    %41 = arith.addf %31, %40 : vector<2x512xf32>
    %c0_12 = arith.constant 0 : index
    %c0_13 = arith.constant 0 : index
    %c24 = arith.constant 24 : index
    %42 = vector.load %arg0[%c0_12, %c0_13, %c24] : memref<3x2x640xf32, #tpu.memory_space<vmem>>, vector<1x2x512xf32>
    %43 = vector.shape_cast %42 : vector<1x2x512xf32> to vector<2x512xf32>
    %c4 = arith.constant 4 : index
    %44 = memref.load %arg1[%c4] : memref<54xf32, #tpu.memory_space<smem>>
    %45 = vector.broadcast %44 : f32 to vector<2x512xf32>
    %46 = arith.mulf %43, %45 : vector<2x512xf32>
    %47 = arith.addf %37, %46 : vector<2x512xf32>
    %c31 = arith.constant 31 : index
    %48 = memref.load %arg1[%c31] : memref<54xf32, #tpu.memory_space<smem>>
    %49 = vector.broadcast %48 : f32 to vector<2x512xf32>
    %50 = arith.mulf %43, %49 : vector<2x512xf32>
    %51 = arith.addf %41, %50 : vector<2x512xf32>
    %c0_14 = arith.constant 0 : index
    %c0_15 = arith.constant 0 : index
    %c25 = arith.constant 25 : index
    %52 = vector.load %arg0[%c0_14, %c0_15, %c25] : memref<3x2x640xf32, #tpu.memory_space<vmem>>, vector<1x2x512xf32>
    %53 = vector.shape_cast %52 : vector<1x2x512xf32> to vector<2x512xf32>
    %c5 = arith.constant 5 : index
    %54 = memref.load %arg1[%c5] : memref<54xf32, #tpu.memory_space<smem>>
    %55 = vector.broadcast %54 : f32 to vector<2x512xf32>
    %56 = arith.mulf %53, %55 : vector<2x512xf32>
    %57 = arith.addf %47, %56 : vector<2x512xf32>
    %c32 = arith.constant 32 : index
    %58 = memref.load %arg1[%c32] : memref<54xf32, #tpu.memory_space<smem>>
    %59 = vector.broadcast %58 : f32 to vector<2x512xf32>
    %60 = arith.mulf %53, %59 : vector<2x512xf32>
    %61 = arith.addf %51, %60 : vector<2x512xf32>
    %c0_16 = arith.constant 0 : index
    %c0_17 = arith.constant 0 : index
    %c46 = arith.constant 46 : index
    %62 = vector.load %arg0[%c0_16, %c0_17, %c46] : memref<3x2x640xf32, #tpu.memory_space<vmem>>, vector<1x2x512xf32>
    %63 = vector.shape_cast %62 : vector<1x2x512xf32> to vector<2x512xf32>
    %c6 = arith.constant 6 : index
    %64 = memref.load %arg1[%c6] : memref<54xf32, #tpu.memory_space<smem>>
    %65 = vector.broadcast %64 : f32 to vector<2x512xf32>
    %66 = arith.mulf %63, %65 : vector<2x512xf32>
    %67 = arith.addf %57, %66 : vector<2x512xf32>
    %c33 = arith.constant 33 : index
    %68 = memref.load %arg1[%c33] : memref<54xf32, #tpu.memory_space<smem>>
    %69 = vector.broadcast %68 : f32 to vector<2x512xf32>
    %70 = arith.mulf %63, %69 : vector<2x512xf32>
    %71 = arith.addf %61, %70 : vector<2x512xf32>
    %c0_18 = arith.constant 0 : index
    %c0_19 = arith.constant 0 : index
    %c47 = arith.constant 47 : index
    %72 = vector.load %arg0[%c0_18, %c0_19, %c47] : memref<3x2x640xf32, #tpu.memory_space<vmem>>, vector<1x2x512xf32>
    %73 = vector.shape_cast %72 : vector<1x2x512xf32> to vector<2x512xf32>
    %c7 = arith.constant 7 : index
    %74 = memref.load %arg1[%c7] : memref<54xf32, #tpu.memory_space<smem>>
    %75 = vector.broadcast %74 : f32 to vector<2x512xf32>
    %76 = arith.mulf %73, %75 : vector<2x512xf32>
    %77 = arith.addf %67, %76 : vector<2x512xf32>
    %c34 = arith.constant 34 : index
    %78 = memref.load %arg1[%c34] : memref<54xf32, #tpu.memory_space<smem>>
    %79 = vector.broadcast %78 : f32 to vector<2x512xf32>
    %80 = arith.mulf %73, %79 : vector<2x512xf32>
    %81 = arith.addf %71, %80 : vector<2x512xf32>
    %c0_20 = arith.constant 0 : index
    %c0_21 = arith.constant 0 : index
    %c48 = arith.constant 48 : index
    %82 = vector.load %arg0[%c0_20, %c0_21, %c48] : memref<3x2x640xf32, #tpu.memory_space<vmem>>, vector<1x2x512xf32>
    %83 = vector.shape_cast %82 : vector<1x2x512xf32> to vector<2x512xf32>
    %c8 = arith.constant 8 : index
    %84 = memref.load %arg1[%c8] : memref<54xf32, #tpu.memory_space<smem>>
    %85 = vector.broadcast %84 : f32 to vector<2x512xf32>
    %86 = arith.mulf %83, %85 : vector<2x512xf32>
    %87 = arith.addf %77, %86 : vector<2x512xf32>
    %c35 = arith.constant 35 : index
    %88 = memref.load %arg1[%c35] : memref<54xf32, #tpu.memory_space<smem>>
    %89 = vector.broadcast %88 : f32 to vector<2x512xf32>
    %90 = arith.mulf %83, %89 : vector<2x512xf32>
    %91 = arith.addf %81, %90 : vector<2x512xf32>
    %c1_22 = arith.constant 1 : index
    %c0_23 = arith.constant 0 : index
    %c0_24 = arith.constant 0 : index
    %92 = vector.load %arg0[%c1_22, %c0_23, %c0_24] : memref<3x2x640xf32, #tpu.memory_space<vmem>>, vector<1x2x512xf32>
    %93 = vector.shape_cast %92 : vector<1x2x512xf32> to vector<2x512xf32>
    %c9 = arith.constant 9 : index
    %94 = memref.load %arg1[%c9] : memref<54xf32, #tpu.memory_space<smem>>
    %95 = vector.broadcast %94 : f32 to vector<2x512xf32>
    %96 = arith.mulf %93, %95 : vector<2x512xf32>
    %97 = arith.addf %87, %96 : vector<2x512xf32>
    %c36 = arith.constant 36 : index
    %98 = memref.load %arg1[%c36] : memref<54xf32, #tpu.memory_space<smem>>
    %99 = vector.broadcast %98 : f32 to vector<2x512xf32>
    %100 = arith.mulf %93, %99 : vector<2x512xf32>
    %101 = arith.addf %91, %100 : vector<2x512xf32>
    %c1_25 = arith.constant 1 : index
    %c0_26 = arith.constant 0 : index
    %c1_27 = arith.constant 1 : index
    %102 = vector.load %arg0[%c1_25, %c0_26, %c1_27] : memref<3x2x640xf32, #tpu.memory_space<vmem>>, vector<1x2x512xf32>
    %103 = vector.shape_cast %102 : vector<1x2x512xf32> to vector<2x512xf32>
    %c10 = arith.constant 10 : index
    %104 = memref.load %arg1[%c10] : memref<54xf32, #tpu.memory_space<smem>>
    %105 = vector.broadcast %104 : f32 to vector<2x512xf32>
    %106 = arith.mulf %103, %105 : vector<2x512xf32>
    %107 = arith.addf %97, %106 : vector<2x512xf32>
    %c37 = arith.constant 37 : index
    %108 = memref.load %arg1[%c37] : memref<54xf32, #tpu.memory_space<smem>>
    %109 = vector.broadcast %108 : f32 to vector<2x512xf32>
    %110 = arith.mulf %103, %109 : vector<2x512xf32>
    %111 = arith.addf %101, %110 : vector<2x512xf32>
    %c1_28 = arith.constant 1 : index
    %c0_29 = arith.constant 0 : index
    %c2_30 = arith.constant 2 : index
    %112 = vector.load %arg0[%c1_28, %c0_29, %c2_30] : memref<3x2x640xf32, #tpu.memory_space<vmem>>, vector<1x2x512xf32>
    %113 = vector.shape_cast %112 : vector<1x2x512xf32> to vector<2x512xf32>
    %c11 = arith.constant 11 : index
    %114 = memref.load %arg1[%c11] : memref<54xf32, #tpu.memory_space<smem>>
    %115 = vector.broadcast %114 : f32 to vector<2x512xf32>
    %116 = arith.mulf %113, %115 : vector<2x512xf32>
    %117 = arith.addf %107, %116 : vector<2x512xf32>
    %c38 = arith.constant 38 : index
    %118 = memref.load %arg1[%c38] : memref<54xf32, #tpu.memory_space<smem>>
    %119 = vector.broadcast %118 : f32 to vector<2x512xf32>
    %120 = arith.mulf %113, %119 : vector<2x512xf32>
    %121 = arith.addf %111, %120 : vector<2x512xf32>
    %c1_31 = arith.constant 1 : index
    %c0_32 = arith.constant 0 : index
    %c23_33 = arith.constant 23 : index
    %122 = vector.load %arg0[%c1_31, %c0_32, %c23_33] : memref<3x2x640xf32, #tpu.memory_space<vmem>>, vector<1x2x512xf32>
    %123 = vector.shape_cast %122 : vector<1x2x512xf32> to vector<2x512xf32>
    %c12 = arith.constant 12 : index
    %124 = memref.load %arg1[%c12] : memref<54xf32, #tpu.memory_space<smem>>
    %125 = vector.broadcast %124 : f32 to vector<2x512xf32>
    %126 = arith.mulf %123, %125 : vector<2x512xf32>
    %127 = arith.addf %117, %126 : vector<2x512xf32>
    %c39 = arith.constant 39 : index
    %128 = memref.load %arg1[%c39] : memref<54xf32, #tpu.memory_space<smem>>
    %129 = vector.broadcast %128 : f32 to vector<2x512xf32>
    %130 = arith.mulf %123, %129 : vector<2x512xf32>
    %131 = arith.addf %121, %130 : vector<2x512xf32>
    %c1_34 = arith.constant 1 : index
    %c0_35 = arith.constant 0 : index
    %c24_36 = arith.constant 24 : index
    %132 = vector.load %arg0[%c1_34, %c0_35, %c24_36] : memref<3x2x640xf32, #tpu.memory_space<vmem>>, vector<1x2x512xf32>
    %133 = vector.shape_cast %132 : vector<1x2x512xf32> to vector<2x512xf32>
    %c13 = arith.constant 13 : index
    %134 = memref.load %arg1[%c13] : memref<54xf32, #tpu.memory_space<smem>>
    %135 = vector.broadcast %134 : f32 to vector<2x512xf32>
    %136 = arith.mulf %133, %135 : vector<2x512xf32>
    %137 = arith.addf %127, %136 : vector<2x512xf32>
    %c40 = arith.constant 40 : index
    %138 = memref.load %arg1[%c40] : memref<54xf32, #tpu.memory_space<smem>>
    %139 = vector.broadcast %138 : f32 to vector<2x512xf32>
    %140 = arith.mulf %133, %139 : vector<2x512xf32>
    %141 = arith.addf %131, %140 : vector<2x512xf32>
    %c1_37 = arith.constant 1 : index
    %c0_38 = arith.constant 0 : index
    %c25_39 = arith.constant 25 : index
    %142 = vector.load %arg0[%c1_37, %c0_38, %c25_39] : memref<3x2x640xf32, #tpu.memory_space<vmem>>, vector<1x2x512xf32>
    %143 = vector.shape_cast %142 : vector<1x2x512xf32> to vector<2x512xf32>
    %c14 = arith.constant 14 : index
    %144 = memref.load %arg1[%c14] : memref<54xf32, #tpu.memory_space<smem>>
    %145 = vector.broadcast %144 : f32 to vector<2x512xf32>
    %146 = arith.mulf %143, %145 : vector<2x512xf32>
    %147 = arith.addf %137, %146 : vector<2x512xf32>
    %c41 = arith.constant 41 : index
    %148 = memref.load %arg1[%c41] : memref<54xf32, #tpu.memory_space<smem>>
    %149 = vector.broadcast %148 : f32 to vector<2x512xf32>
    %150 = arith.mulf %143, %149 : vector<2x512xf32>
    %151 = arith.addf %141, %150 : vector<2x512xf32>
    %c1_40 = arith.constant 1 : index
    %c0_41 = arith.constant 0 : index
    %c46_42 = arith.constant 46 : index
    %152 = vector.load %arg0[%c1_40, %c0_41, %c46_42] : memref<3x2x640xf32, #tpu.memory_space<vmem>>, vector<1x2x512xf32>
    %153 = vector.shape_cast %152 : vector<1x2x512xf32> to vector<2x512xf32>
    %c15 = arith.constant 15 : index
    %154 = memref.load %arg1[%c15] : memref<54xf32, #tpu.memory_space<smem>>
    %155 = vector.broadcast %154 : f32 to vector<2x512xf32>
    %156 = arith.mulf %153, %155 : vector<2x512xf32>
    %157 = arith.addf %147, %156 : vector<2x512xf32>
    %c42 = arith.constant 42 : index
    %158 = memref.load %arg1[%c42] : memref<54xf32, #tpu.memory_space<smem>>
    %159 = vector.broadcast %158 : f32 to vector<2x512xf32>
    %160 = arith.mulf %153, %159 : vector<2x512xf32>
    %161 = arith.addf %151, %160 : vector<2x512xf32>
    %c1_43 = arith.constant 1 : index
    %c0_44 = arith.constant 0 : index
    %c47_45 = arith.constant 47 : index
    %162 = vector.load %arg0[%c1_43, %c0_44, %c47_45] : memref<3x2x640xf32, #tpu.memory_space<vmem>>, vector<1x2x512xf32>
    %163 = vector.shape_cast %162 : vector<1x2x512xf32> to vector<2x512xf32>
    %c16 = arith.constant 16 : index
    %164 = memref.load %arg1[%c16] : memref<54xf32, #tpu.memory_space<smem>>
    %165 = vector.broadcast %164 : f32 to vector<2x512xf32>
    %166 = arith.mulf %163, %165 : vector<2x512xf32>
    %167 = arith.addf %157, %166 : vector<2x512xf32>
    %c43 = arith.constant 43 : index
    %168 = memref.load %arg1[%c43] : memref<54xf32, #tpu.memory_space<smem>>
    %169 = vector.broadcast %168 : f32 to vector<2x512xf32>
    %170 = arith.mulf %163, %169 : vector<2x512xf32>
    %171 = arith.addf %161, %170 : vector<2x512xf32>
    %c1_46 = arith.constant 1 : index
    %c0_47 = arith.constant 0 : index
    %c48_48 = arith.constant 48 : index
    %172 = vector.load %arg0[%c1_46, %c0_47, %c48_48] : memref<3x2x640xf32, #tpu.memory_space<vmem>>, vector<1x2x512xf32>
    %173 = vector.shape_cast %172 : vector<1x2x512xf32> to vector<2x512xf32>
    %c17 = arith.constant 17 : index
    %174 = memref.load %arg1[%c17] : memref<54xf32, #tpu.memory_space<smem>>
    %175 = vector.broadcast %174 : f32 to vector<2x512xf32>
    %176 = arith.mulf %173, %175 : vector<2x512xf32>
    %177 = arith.addf %167, %176 : vector<2x512xf32>
    %c44 = arith.constant 44 : index
    %178 = memref.load %arg1[%c44] : memref<54xf32, #tpu.memory_space<smem>>
    %179 = vector.broadcast %178 : f32 to vector<2x512xf32>
    %180 = arith.mulf %173, %179 : vector<2x512xf32>
    %181 = arith.addf %171, %180 : vector<2x512xf32>
    %c2_49 = arith.constant 2 : index
    %c0_50 = arith.constant 0 : index
    %c0_51 = arith.constant 0 : index
    %182 = vector.load %arg0[%c2_49, %c0_50, %c0_51] : memref<3x2x640xf32, #tpu.memory_space<vmem>>, vector<1x2x512xf32>
    %183 = vector.shape_cast %182 : vector<1x2x512xf32> to vector<2x512xf32>
    %c18 = arith.constant 18 : index
    %184 = memref.load %arg1[%c18] : memref<54xf32, #tpu.memory_space<smem>>
    %185 = vector.broadcast %184 : f32 to vector<2x512xf32>
    %186 = arith.mulf %183, %185 : vector<2x512xf32>
    %187 = arith.addf %177, %186 : vector<2x512xf32>
    %c45 = arith.constant 45 : index
    %188 = memref.load %arg1[%c45] : memref<54xf32, #tpu.memory_space<smem>>
    %189 = vector.broadcast %188 : f32 to vector<2x512xf32>
    %190 = arith.mulf %183, %189 : vector<2x512xf32>
    %191 = arith.addf %181, %190 : vector<2x512xf32>
    %c2_52 = arith.constant 2 : index
    %c0_53 = arith.constant 0 : index
    %c1_54 = arith.constant 1 : index
    %192 = vector.load %arg0[%c2_52, %c0_53, %c1_54] : memref<3x2x640xf32, #tpu.memory_space<vmem>>, vector<1x2x512xf32>
    %193 = vector.shape_cast %192 : vector<1x2x512xf32> to vector<2x512xf32>
    %c19 = arith.constant 19 : index
    %194 = memref.load %arg1[%c19] : memref<54xf32, #tpu.memory_space<smem>>
    %195 = vector.broadcast %194 : f32 to vector<2x512xf32>
    %196 = arith.mulf %193, %195 : vector<2x512xf32>
    %197 = arith.addf %187, %196 : vector<2x512xf32>
    %c46_55 = arith.constant 46 : index
    %198 = memref.load %arg1[%c46_55] : memref<54xf32, #tpu.memory_space<smem>>
    %199 = vector.broadcast %198 : f32 to vector<2x512xf32>
    %200 = arith.mulf %193, %199 : vector<2x512xf32>
    %201 = arith.addf %191, %200 : vector<2x512xf32>
    %c2_56 = arith.constant 2 : index
    %c0_57 = arith.constant 0 : index
    %c2_58 = arith.constant 2 : index
    %202 = vector.load %arg0[%c2_56, %c0_57, %c2_58] : memref<3x2x640xf32, #tpu.memory_space<vmem>>, vector<1x2x512xf32>
    %203 = vector.shape_cast %202 : vector<1x2x512xf32> to vector<2x512xf32>
    %c20 = arith.constant 20 : index
    %204 = memref.load %arg1[%c20] : memref<54xf32, #tpu.memory_space<smem>>
    %205 = vector.broadcast %204 : f32 to vector<2x512xf32>
    %206 = arith.mulf %203, %205 : vector<2x512xf32>
    %207 = arith.addf %197, %206 : vector<2x512xf32>
    %c47_59 = arith.constant 47 : index
    %208 = memref.load %arg1[%c47_59] : memref<54xf32, #tpu.memory_space<smem>>
    %209 = vector.broadcast %208 : f32 to vector<2x512xf32>
    %210 = arith.mulf %203, %209 : vector<2x512xf32>
    %211 = arith.addf %201, %210 : vector<2x512xf32>
    %c2_60 = arith.constant 2 : index
    %c0_61 = arith.constant 0 : index
    %c23_62 = arith.constant 23 : index
    %212 = vector.load %arg0[%c2_60, %c0_61, %c23_62] : memref<3x2x640xf32, #tpu.memory_space<vmem>>, vector<1x2x512xf32>
    %213 = vector.shape_cast %212 : vector<1x2x512xf32> to vector<2x512xf32>
    %c21 = arith.constant 21 : index
    %214 = memref.load %arg1[%c21] : memref<54xf32, #tpu.memory_space<smem>>
    %215 = vector.broadcast %214 : f32 to vector<2x512xf32>
    %216 = arith.mulf %213, %215 : vector<2x512xf32>
    %217 = arith.addf %207, %216 : vector<2x512xf32>
    %c48_63 = arith.constant 48 : index
    %218 = memref.load %arg1[%c48_63] : memref<54xf32, #tpu.memory_space<smem>>
    %219 = vector.broadcast %218 : f32 to vector<2x512xf32>
    %220 = arith.mulf %213, %219 : vector<2x512xf32>
    %221 = arith.addf %211, %220 : vector<2x512xf32>
    %c2_64 = arith.constant 2 : index
    %c0_65 = arith.constant 0 : index
    %c24_66 = arith.constant 24 : index
    %222 = vector.load %arg0[%c2_64, %c0_65, %c24_66] : memref<3x2x640xf32, #tpu.memory_space<vmem>>, vector<1x2x512xf32>
    %223 = vector.shape_cast %222 : vector<1x2x512xf32> to vector<2x512xf32>
    %c22 = arith.constant 22 : index
    %224 = memref.load %arg1[%c22] : memref<54xf32, #tpu.memory_space<smem>>
    %225 = vector.broadcast %224 : f32 to vector<2x512xf32>
    %226 = arith.mulf %223, %225 : vector<2x512xf32>
    %227 = arith.addf %217, %226 : vector<2x512xf32>
    %c49 = arith.constant 49 : index
    %228 = memref.load %arg1[%c49] : memref<54xf32, #tpu.memory_space<smem>>
    %229 = vector.broadcast %228 : f32 to vector<2x512xf32>
    %230 = arith.mulf %223, %229 : vector<2x512xf32>
    %231 = arith.addf %221, %230 : vector<2x512xf32>
    %c2_67 = arith.constant 2 : index
    %c0_68 = arith.constant 0 : index
    %c25_69 = arith.constant 25 : index
    %232 = vector.load %arg0[%c2_67, %c0_68, %c25_69] : memref<3x2x640xf32, #tpu.memory_space<vmem>>, vector<1x2x512xf32>
    %233 = vector.shape_cast %232 : vector<1x2x512xf32> to vector<2x512xf32>
    %c23_70 = arith.constant 23 : index
    %234 = memref.load %arg1[%c23_70] : memref<54xf32, #tpu.memory_space<smem>>
    %235 = vector.broadcast %234 : f32 to vector<2x512xf32>
    %236 = arith.mulf %233, %235 : vector<2x512xf32>
    %237 = arith.addf %227, %236 : vector<2x512xf32>
    %c50 = arith.constant 50 : index
    %238 = memref.load %arg1[%c50] : memref<54xf32, #tpu.memory_space<smem>>
    %239 = vector.broadcast %238 : f32 to vector<2x512xf32>
    %240 = arith.mulf %233, %239 : vector<2x512xf32>
    %241 = arith.addf %231, %240 : vector<2x512xf32>
    %c2_71 = arith.constant 2 : index
    %c0_72 = arith.constant 0 : index
    %c46_73 = arith.constant 46 : index
    %242 = vector.load %arg0[%c2_71, %c0_72, %c46_73] : memref<3x2x640xf32, #tpu.memory_space<vmem>>, vector<1x2x512xf32>
    %243 = vector.shape_cast %242 : vector<1x2x512xf32> to vector<2x512xf32>
    %c24_74 = arith.constant 24 : index
    %244 = memref.load %arg1[%c24_74] : memref<54xf32, #tpu.memory_space<smem>>
    %245 = vector.broadcast %244 : f32 to vector<2x512xf32>
    %246 = arith.mulf %243, %245 : vector<2x512xf32>
    %247 = arith.addf %237, %246 : vector<2x512xf32>
    %c51 = arith.constant 51 : index
    %248 = memref.load %arg1[%c51] : memref<54xf32, #tpu.memory_space<smem>>
    %249 = vector.broadcast %248 : f32 to vector<2x512xf32>
    %250 = arith.mulf %243, %249 : vector<2x512xf32>
    %251 = arith.addf %241, %250 : vector<2x512xf32>
    %c2_75 = arith.constant 2 : index
    %c0_76 = arith.constant 0 : index
    %c47_77 = arith.constant 47 : index
    %252 = vector.load %arg0[%c2_75, %c0_76, %c47_77] : memref<3x2x640xf32, #tpu.memory_space<vmem>>, vector<1x2x512xf32>
    %253 = vector.shape_cast %252 : vector<1x2x512xf32> to vector<2x512xf32>
    %c25_78 = arith.constant 25 : index
    %254 = memref.load %arg1[%c25_78] : memref<54xf32, #tpu.memory_space<smem>>
    %255 = vector.broadcast %254 : f32 to vector<2x512xf32>
    %256 = arith.mulf %253, %255 : vector<2x512xf32>
    %257 = arith.addf %247, %256 : vector<2x512xf32>
    %c52 = arith.constant 52 : index
    %258 = memref.load %arg1[%c52] : memref<54xf32, #tpu.memory_space<smem>>
    %259 = vector.broadcast %258 : f32 to vector<2x512xf32>
    %260 = arith.mulf %253, %259 : vector<2x512xf32>
    %261 = arith.addf %251, %260 : vector<2x512xf32>
    %c2_79 = arith.constant 2 : index
    %c0_80 = arith.constant 0 : index
    %c48_81 = arith.constant 48 : index
    %262 = vector.load %arg0[%c2_79, %c0_80, %c48_81] : memref<3x2x640xf32, #tpu.memory_space<vmem>>, vector<1x2x512xf32>
    %263 = vector.shape_cast %262 : vector<1x2x512xf32> to vector<2x512xf32>
    %c26 = arith.constant 26 : index
    %264 = memref.load %arg1[%c26] : memref<54xf32, #tpu.memory_space<smem>>
    %265 = vector.broadcast %264 : f32 to vector<2x512xf32>
    %266 = arith.mulf %263, %265 : vector<2x512xf32>
    %267 = arith.addf %257, %266 : vector<2x512xf32>
    %c53 = arith.constant 53 : index
    %268 = memref.load %arg1[%c53] : memref<54xf32, #tpu.memory_space<smem>>
    %269 = vector.broadcast %268 : f32 to vector<2x512xf32>
    %270 = arith.mulf %263, %269 : vector<2x512xf32>
    %271 = arith.addf %261, %270 : vector<2x512xf32>
    %cst_82 = arith.constant 0.000000e+00 : f32
    %272 = vector.broadcast %cst_82 : f32 to vector<2x128xf32>
    %c0_83 = arith.constant 0 : index
    %273 = memref.load %arg2[%c0_83] : memref<2xf32, #tpu.memory_space<smem>>
    %274 = vector.broadcast %273 : f32 to vector<2x512xf32>
    %275 = arith.addf %267, %274 : vector<2x512xf32>
    %cst_84 = arith.constant 0.000000e+00 : f32
    %276 = vector.broadcast %cst_84 : f32 to vector<2x512xf32>
    %277 = arith.maximumf %275, %276 : vector<2x512xf32>
    %278 = arith.truncf %277 : vector<2x512xf32> to vector<2x512xbf16>
    %c0_85 = arith.constant 0 : index
    %c0_86 = arith.constant 0 : index
    %c0_87 = arith.constant 0 : index
    %279 = vector.load %arg3[%c0_85, %c0_86, %c0_87] : memref<2x512x128xbf16, #tpu.memory_space<vmem>>, vector<1x512x128xbf16>
    %280 = vector.shape_cast %279 : vector<1x512x128xbf16> to vector<512x128xbf16>
    %cst_88 = arith.constant dense<0.000000e+00> : vector<2x128xf32>
    %281 = tpu.matmul %278, %280, %cst_88 {dimension_numbers = #tpu.dot_dimension_numbers<[1], [0], [0], [1], [0, 0, 1, 1], [], []>} : vector<2x512xbf16>, vector<512x128xbf16>, vector<2x128xf32> -> vector<2x128xf32>
    %282 = arith.addf %272, %281 : vector<2x128xf32>
    %c1_89 = arith.constant 1 : index
    %283 = memref.load %arg2[%c1_89] : memref<2xf32, #tpu.memory_space<smem>>
    %284 = vector.broadcast %283 : f32 to vector<2x512xf32>
    %285 = arith.addf %271, %284 : vector<2x512xf32>
    %cst_90 = arith.constant 0.000000e+00 : f32
    %286 = vector.broadcast %cst_90 : f32 to vector<2x512xf32>
    %287 = arith.maximumf %285, %286 : vector<2x512xf32>
    %288 = arith.truncf %287 : vector<2x512xf32> to vector<2x512xbf16>
    %c1_91 = arith.constant 1 : index
    %c0_92 = arith.constant 0 : index
    %c0_93 = arith.constant 0 : index
    %289 = vector.load %arg3[%c1_91, %c0_92, %c0_93] : memref<2x512x128xbf16, #tpu.memory_space<vmem>>, vector<1x512x128xbf16>
    %290 = vector.shape_cast %289 : vector<1x512x128xbf16> to vector<512x128xbf16>
    %cst_94 = arith.constant dense<0.000000e+00> : vector<2x128xf32>
    %291 = tpu.matmul %288, %290, %cst_94 {dimension_numbers = #tpu.dot_dimension_numbers<[1], [0], [0], [1], [0, 0, 1, 1], [], []>} : vector<2x512xbf16>, vector<512x128xbf16>, vector<2x128xf32> -> vector<2x128xf32>
    %292 = arith.addf %282, %291 : vector<2x128xf32>
    %c0_95 = arith.constant 0 : index
    %c0_96 = arith.constant 0 : index
    %293 = vector.load %arg4[%c0_95, %c0_96] : memref<1x128xf32, #tpu.memory_space<vmem>>, vector<1x128xf32>
    %294 = vector.broadcast %293 : vector<1x128xf32> to vector<2x128xf32>
    %295 = arith.addf %292, %294 : vector<2x128xf32>
    %cst_97 = arith.constant 0.000000e+00 : f32
    %296 = vector.broadcast %cst_97 : f32 to vector<2x128xf32>
    %297 = arith.maximumf %295, %296 : vector<2x128xf32>
    %c0_98 = arith.constant 0 : index
    %c0_99 = arith.constant 0 : index
    %298 = vector.load %arg5[%c0_98, %c0_99] : memref<2x128xf32, #tpu.memory_space<vmem>>, vector<2x128xf32>
    tpu.vector_store %arg5[%c0_98, %c0_99], %297 {strides = array<i32>} : memref<2x128xf32, #tpu.memory_space<vmem>>, vector<2x128xf32>,
    return
  }
}

</mosaic_0001>

<bundles_post_ra>
// kernel: encoder_forward.1
= control target key start
LH: loop header
LB: loop body
LE: loop exit
PB: predicated region body
PF: predicated region fallthrough
CT: control target
= control target key end

     0   :  { %10 = vsyncpa [#allocation4], 0  ;;  %s2818_s0 = inlined_call_operand.vmem [shape: f32[3,2,640], index: 0, kind: input, shape index: {}]   ;;  %s2819_s1 = inlined_call_operand.vmem [shape: f32[54], index: 1, kind: input, shape index: {}]   ;;  %s2820_s2 = inlined_call_operand.vmem [shape: f32[2], index: 2, kind: input, shape index: {}]   ;;  %s2821_s3 = inlined_call_operand.vmem [shape: bf16[2,512,128], index: 3, kind: input, shape index: {}]   ;;  %s2822_s4 = inlined_call_operand.vmem [shape: f32[1,128], index: 4, kind: input, shape index: {}]   ;;  %s2823_s5 = inlined_call_operand.hbm [shape: f32[2,128], index: 5, kind: output, shape index: {}]  }
   0x1   :  { %11 = vsyncpa [#allocation6], 0 }
   0x2   :  { %12 = vsyncpa [#allocation3], 0  ;;  %s21_s20 = sshll.u32 %s2819_s1, 4  ;;  %s31_s23 = sshll.u32 %s2820_s2, 4  ;;  %s22_s20 = int_to_ptr.vmem [resolvable:$true] %s21_s20  ;;  %s32_s23 = int_to_ptr.vmem [resolvable:$true] %s31_s23 }
   0x3   :  { %s1974_s24 = scalar_lea.vmem %s22_s20, 16  ;;  %p1979_p1 = scmp.lt.s32.totalorder %s22_s20, %s22_s20 }
   0x4   :  { %p1975_p0 = scmp.ne.s32.totalorder %s22_s20, %s1974_s24  ;;  %p1980_p2 = scmp.lt.s32.totalorder %s1974_s24, %s1974_s24 }
   0x6   :  { %p1981_p3 = por %p1980_p2, %p1979_p1 }
   0x8   :  { %p1982_p4 = pnand %p1981_p3, %p1975_p0 }
   0xa   :  { %1985 = shalt.err (!%p1982_p4)
}
   0xb   :  { %s2026_s25 = smov [#allocation2]   ;;  %s1986_s26 = scalar_lea.vmem %s32_s23, 16 }
   0xc   :  { %24 = dma.vmem_to_smem %s22_s20, 16, %s2026_s25, [#allocation4]  }
   0xd   :  { %p1987_p5 = scmp.ne.s32.totalorder %s32_s23, %s1986_s26  ;;  %p1991_p6 = scmp.lt.s32.totalorder %s32_s23, %s32_s23 }
   0xe   :  { %p1992_p7 = scmp.lt.s32.totalorder %s1986_s26, %s1986_s26 }
  0x10   :  { %p1993_p8 = por %p1992_p7, %p1991_p6 }
  0x12   :  { %p1994_p9 = pnand %p1993_p8, %p1987_p5 }
  0x14   :  { %1997 = shalt.err (!%p1994_p9)
}
  0x15   :  { %s2027_s1 = smov [#allocation5]  }
  0x16   :  { %34 = dma.vmem_to_smem %s32_s23, 16, %s2027_s1, [#allocation6]  }
  0x17   :  { %2020 = dma.done.wait [#allocation4], 16  }
  0x18   :  { %2021 = vsyncadd [#allocation4], 4294967280 }
  0x19   :  { %2022 = dma.done.wait [#allocation6], 16  }
  0x1a   :  { %2023 = vsyncadd [#allocation6], 4294967280 }
  0x1b   :  { %45 = sfence }
  0x1c   :  { %s1622_s2 = sld [smem:[#allocation2 + $0x1d]]  ;;  %s1620_s27 = sld [smem:[#allocation2 + $0x1c]]  ;;  %v2077_v0 = vld [vmem:[%s2818_s0] sm:$0xff]  ;;  %v2082_v1 = vld [vmem:[%s2818_s0 + $0x8] sm:$0x3]  ;;  %v2122_v28 = vld [vmem:[%s2818_s0 + $0xa] sm:$0xff] }
  0x1d   :  { %s1624_s28 = sld [smem:[#allocation2 + $0x1e]]  ;;  %s1626_s8 = sld [smem:[#allocation2 + $0x1f]]  ;;  %v2113_v24 = vld [vmem:[%s2818_s0 + $0x12] sm:$0x3]  ;;  %v2173_v61 = vld [vmem:[%s2818_s0 + $0x1c] sm:$0x3] }
  0x1e   :  { %s2028_s9 = smov 126   ;;  %s2029_s10 = smov 127   ;;  %v2179_v63 = vld [vmem:[%s2818_s0 + $0x14] sm:$0xff]  ;;  %vm70_vm0 = vcmask 1045504   ;;  %vm72_vm1 = vcmask 1039360   ;;  %vm105_vm2 = vcmask 1031168  }
  0x1f   :  { %s1628_s11 = sld [smem:[#allocation2 + $0x20]]  ;;  %s1630_s12 = sld [smem:[#allocation2 + $0x21]]  ;;  %vm138_vm3 = vcmask 859136   ;;  %vm171_vm4 = vcmask 850944   ;;  %vm204_vm5 = vcmask 842752   ;;  %vm237_vm6 = vcmask 670720  }
  0x20   :  { %s2030_s13 = smov 105   ;;  %s1632_s14 = sld [smem:[#allocation2 + $0x22]]  ;;  %vm270_vm7 = vcmask 662528   ;;  %vm303_vm8 = vcmask 654336  }
  0x21   :  { %s2031_s15 = smov 104   ;;  %s1634_s16 = sld [smem:[#allocation2 + $0x23]] }
  0x22   :  { %v110_v2 = vstv %s1622_s2  ;;  %v77_v4 = vstv %s1620_s27  ;;  %s2032_s17 = smov 103   ;;  %s1641_s18 = sld [smem:[#allocation2 + $0x25]] }
  0x23   :  { %v111_v3 = vmul.f32 %v110_v2, %v2077_v0  ;;  %v78_v5 = vmul.f32 %v77_v4, %v2077_v0  ;;  %v112_v6 = vmul.f32 %v110_v2, %v2082_v1  ;;  %v79_v7 = vmul.f32 %v77_v4, %v2082_v1  ;;  %s2033_s19 = smov 82   ;;  %s1643_s20 = sld [smem:[#allocation2 + $0x26]] }
  0x24   :  { %v143_v8 = vstv %s1624_s28  ;;  %v176_v11 = vstv %s1626_s8  ;;  %s2034_s23 = smov 81   ;;  %s1645_s24 = sld [smem:[#allocation2 + $0x27]] }
  0x25   :  { %115 = vrot.lane.b32.xlu1 %v111_v3, %s2028_s9  ;;  %82 = vrot.lane.b32.xlu0 %v78_v5, %s2029_s10  ;;  %v145_v9 = vmul.f32 %v143_v8, %v2082_v1  ;;  %v144_v10 = vmul.f32 %v143_v8, %v2077_v0  ;;  %v178_v12 = vmul.f32 %v176_v11, %v2082_v1  ;;  %v209_v14 = vstv %s1628_s11  ;;  %s2035_s1 = smov 80   ;;  %s1647_s2 = sld [smem:[#allocation2 + $0x28]] }
  0x26   :  { %v177_v13 = vmul.f32 %v176_v11, %v2077_v0  ;;  %v211_v15 = vmul.f32 %v209_v14, %v2082_v1  ;;  %v210_v16 = vmul.f32 %v209_v14, %v2077_v0  ;;  %v242_v17 = vstv %s1630_s12  ;;  %s1649_s27 = sld [smem:[#allocation2 + $0x29]]  ;;  %s1651_s28 = sld [smem:[#allocation2 + $0x2a]] }
  0x27   :  { %v244_v18 = vmul.f32 %v242_v17, %v2082_v1  ;;  %v243_v19 = vmul.f32 %v242_v17, %v2077_v0  ;;  %v275_v20 = vstv %s1632_s14  ;;  %v308_v23 = vstv %s1634_s16  ;;  %s1653_s29 = sld [smem:[#allocation2 + $0x2b]]  ;;  %s1619_s30 = sld [smem:[#allocation2 + $0x1]] }
  0x28   :  { %v277_v21 = vmul.f32 %v275_v20, %v2082_v1  ;;  %v276_v22 = vmul.f32 %v275_v20, %v2077_v0  ;;  %v310_v25 = vmul.f32 %v308_v23, %v2082_v1  ;;  %v309_v26 = vmul.f32 %v308_v23, %v2077_v0  ;;  %s1655_s6 = sld [smem:[#allocation2 + $0x2c]]  ;;  %s1621_s7 = sld [smem:[#allocation2 + $0x2]]  ;;  %v1907_v23 = vld [vmem:[%s2821_s3 + $0x140] sm:$0xff]  }
  0x29   :  { %117 = vrot.lane.b32.xlu1 %v112_v6, %s2028_s9  ;;  %84 = vrot.lane.b32.xlu0 %v79_v7, %s2029_s10  ;;  %v352_v27 = vstv %s1641_s18  ;;  %v384_v31 = vstv %s1643_s20  ;;  %s1623_s8 = sld [smem:[#allocation2 + $0x3]]  ;;  %s2150_s11 = sld [smem:[#allocation2 + $0x2e]] }
  0x2a   :  { %v354_v29 = vmul.f32 %v2113_v24, %v352_v27  ;;  %v353_v30 = vmul.f32 %v2122_v28, %v352_v27  ;;  %v386_v32 = vmul.f32 %v2113_v24, %v384_v31  ;;  %v416_v33 = vstv %s1645_s24  ;;  %s1625_s12 = sld [smem:[#allocation2 + $0x4]]  ;;  %s1664_s18 = sld [smem:[#allocation2 + $0x2f]]  ;;  %1807 = vmatprep.subr.bf16.mxu0 %v1907_v23 }
  0x2b   :  { %v385_v34 = vmul.f32 %v2122_v28, %v384_v31  ;;  %v418_v35 = vmul.f32 %v2113_v24, %v416_v33  ;;  %v448_v36 = vstv %s1647_s2  ;;  %v417_v37 = vmul.f32 %v2122_v28, %v416_v33  ;;  %s1627_s22 = sld [smem:[#allocation2 + $0x5]]  ;;  %s1666_s24 = sld [smem:[#allocation2 + $0x30]]  ;;  %v1910_v31 = vld [vmem:[%s2821_s3 + $0x180] sm:$0xff]  }
  0x2c   :  { %v450_v38 = vmul.f32 %v2113_v24, %v448_v36  ;;  %v480_v39 = vstv %s1649_s27  ;;  %v449_v40 = vmul.f32 %v2122_v28, %v448_v36  ;;  %v512_v42 = vstv %s1651_s28  ;;  %s1629_s25 = sld [smem:[#allocation2 + $0x6]]  ;;  %s1668_s26 = sld [smem:[#allocation2 + $0x31]] }
  0x2d   :  { %150 = vrot.lane.b32.xlu1 %v145_v9, %s2030_s13  ;;  %148 = vrot.lane.b32.xlu0 %v144_v10, %s2030_s13  ;;  %v482_v41 = vmul.f32 %v2113_v24, %v480_v39  ;;  %v481_v43 = vmul.f32 %v2122_v28, %v480_v39  ;;  %v514_v44 = vmul.f32 %v2113_v24, %v512_v42  ;;  %v544_v46 = vstv %s1653_s29  ;;  %s1631_s2 = sld [smem:[#allocation2 + $0x7]]  ;;  %s1670_s27 = sld [smem:[#allocation2 + $0x32]]  ;;  %v1915_v39 = vld [vmem:[%s2821_s3 + $0x150] sm:$0xff]  }
  0x2e   :  { %v513_v45 = vmul.f32 %v2122_v28, %v512_v42  ;;  %v546_v47 = vmul.f32 %v2113_v24, %v544_v46  ;;  %v59_v48 = vstv %s1619_s30  ;;  %v545_v49 = vmul.f32 %v2122_v28, %v544_v46  ;;  %s2209_s28 = sld [smem:[#allocation2 + $0x8]]  ;;  %s1665_s14 = sld [smem:[#allocation2 + $0x15]] }
  0x2f   :  { %v576_v50 = vstv %s1655_s6  ;;  %v61_v51 = vmul.f32 %v59_v48, %v2082_v1  ;;  %v60_v52 = vmul.f32 %v59_v48, %v2077_v0  ;;  %v93_v53 = vstv %s1621_s7  ;;  %s2259_s7 = sld [smem:[#allocation2 + $0x1b]]  ;;  %s2343_s6 = sld [smem:[#allocation2 + $0xd]] }
  0x30   :  { %v578_v54 = vmul.f32 %v2113_v24, %v576_v50  ;;  %v577_v55 = vmul.f32 %v2122_v28, %v576_v50  ;;  %v95_v56 = vmul.f32 %v93_v53, %v2082_v1  ;;  %v94_v57 = vmul.f32 %v93_v53, %v2077_v0  ;;  %v1921_v50 = vld [vmem:[%s2821_s3 + $0x1d8] sm:$0xff]   ;;  %s2390_s30 = sld [smem:[#allocation2 + $0x10]]  ;;  %s1667_s16 = sld [smem:[#allocation2 + $0x16]] }
  0x31   :  { %183 = vrot.lane.b32.xlu1 %v178_v12, %s2031_s15  ;;  %181 = vrot.lane.b32.xlu0 %v177_v13, %s2031_s15  ;;  %v126_v58 = vstv %s1623_s8  ;;  %v620_v62 = vstv %s2150_s11  ;;  %s2221_s8 = sld [smem:[#allocation2 + $0x33]]  ;;  %s2261_s11 = sld [smem:[#allocation2 + $0xa]] }
  0x32   :  { %v128_v59 = vmul.f32 %v126_v58, %v2082_v1  ;;  %v127_v60 = vmul.f32 %v126_v58, %v2077_v0  ;;  %v622_v2 = vmul.f32 %v2173_v61, %v620_v62  ;;  %v621_v3 = vmul.f32 %v2179_v63, %v620_v62  ;;  %s1671_s21 = sld [smem:[#allocation2 + $0x18]] }
  0x33   :  { %v159_v4 = vstv %s1625_s12  ;;  %v652_v7 = vstv %s1664_s18  ;;  %v192_v10 = vstv %s1627_s22  ;;  %v684_v13 = vstv %s1666_s24  ;;  %s2240_s24 = sld [smem:[#allocation2 + $0x34]]  ;;  %s2300_s12 = sld [smem:[#allocation2 + $0xb]] }
  0x34   :  { %v161_v5 = vmul.f32 %v159_v4, %v2082_v1  ;;  %v160_v6 = vmul.f32 %v159_v4, %v2077_v0  ;;  %v654_v8 = vmul.f32 %v2173_v61, %v652_v7  ;;  %v653_v9 = vmul.f32 %v2179_v63, %v652_v7  ;;  %s2321_s22 = sld [smem:[#allocation2 + $0xc]] }
  0x35   :  { %216 = vrot.lane.b32.xlu1 %v211_v15, %s2032_s17  ;;  %214 = vrot.lane.b32.xlu0 %v210_v16, %s2032_s17  ;;  %v194_v11 = vmul.f32 %v192_v10, %v2082_v1  ;;  %v193_v12 = vmul.f32 %v192_v10, %v2077_v0  ;;  %v686_v14 = vmul.f32 %v2173_v61, %v684_v13  ;;  %v225_v16 = vstv %s1629_s25  ;;  %s2280_s25 = sld [smem:[#allocation2 + $0x35]] }
  0x36   :  { %v685_v15 = vmul.f32 %v2179_v63, %v684_v13  ;;  %v227_v17 = vmul.f32 %v225_v16, %v2082_v1  ;;  %v291_v36 = vstv %s2209_s28  ;;  %v53_v58 = vstv %s2259_s7  ;;  %s2399_s28 = sld [smem:[#allocation2 + $0x11]] }
  0x37   :  { %v292_v42 = vmul.f32 %v291_v36, %v2077_v0 }
  0x39   :  { %249 = vrot.lane.b32.xlu1 %v244_v18, %s2033_s19  ;;  %247 = vrot.lane.b32.xlu0 %v243_v19, %s2033_s19  ;;  %v226_v18 = vmul.f32 %v225_v16, %v2077_v0  ;;  %v716_v19 = vstv %s1668_s26 }
  0x3a   :  { %v718_v20 = vmul.f32 %v2173_v61, %v716_v19 }
  0x3d   :  { %282 = vrot.lane.b32.xlu1 %v277_v21, %s2034_s23  ;;  %280 = vrot.lane.b32.xlu0 %v276_v22, %s2034_s23  ;;  %v717_v21 = vmul.f32 %v2179_v63, %v716_v19  ;;  %v258_v22 = vstv %s1631_s2 }
  0x3e   :  { %v259_v27 = vmul.f32 %v258_v22, %v2077_v0 }
  0x41   :  { %315 = vrot.lane.b32.xlu1 %v310_v25, %s2035_s1  ;;  %313 = vrot.lane.b32.xlu0 %v309_v26, %s2035_s1  ;;  %v260_v25 = vmul.f32 %v258_v22, %v2082_v1  ;;  %v1908_v26 = vld [vmem:[%s2821_s3 + $0x100] sm:$0xff]   ;;  %v1931_v22 = vld [vmem:[%s2821_s3 + $0x170] sm:$0xff]  }
  0x42   :  { %1808 = vmatpush3.bf16.msra.mxu0 %v1908_v26 }
  0x45   :  { %359 = vrot.lane.b32.xlu1 %v354_v29, %s2029_s10  ;;  %357 = vrot.lane.b32.xlu0 %v353_v30, %s2029_s10  ;;  %v748_v29 = vstv %s1670_s27  ;;  %v1909_v30 = vld [vmem:[%s2821_s3 + $0x1c0] sm:$0xff]  }
  0x46   :  { %1829 = vmatprep.subr.bf16.mxu1 %v1909_v30  ;;  %v750_v33 = vmul.f32 %v2173_v61, %v748_v29  ;;  %v368_v30 = vstv %s2300_s12  ;;  %s1669_s12 = sld [smem:[#allocation2 + $0x17]] }
  0x47   :  { %1830 = vmatpush3.bf16.msra.mxu1 %v1910_v31  ;;  %v1933_v31 = vld [vmem:[%s2821_s3 + $0x1f0] sm:$0xff]  }
  0x49   :  { %391 = vrot.lane.b32.xlu1 %v386_v32, %s2028_s9  ;;  %389 = vrot.lane.b32.xlu0 %v385_v34, %s2028_s9  ;;  %v1911_v32 = vld [vmem:[%s2821_s3 + $0x148] sm:$0xff]  }
  0x4a   :  { %v1912_v34 = vld [vmem:[%s2821_s3 + $0x108] sm:$0xff]   ;;  %1809 = vmatprep.subr.bf16.mxu0 %v1911_v32 }
  0x4b   :  { %1810 = vmatpush3.bf16.msra.mxu0 %v1912_v34 }
  0x4c   :  { %1811 = vmatprep.subr.bf16.mxu0 %v1915_v39  ;;  %v1935_v39 = vld [vmem:[%s2821_s3 + $0x178] sm:$0xff]  }
  0x4d   :  { %423 = vrot.lane.b32.xlu1 %v418_v35, %s2030_s13  ;;  %421 = vrot.lane.b32.xlu0 %v417_v37, %s2030_s13  ;;  %v749_v35 = vmul.f32 %v2179_v63, %v748_v29  ;;  %v1913_v37 = vld [vmem:[%s2821_s3 + $0x1c8] sm:$0xff]  }
  0x4e   :  { %1831 = vmatprep.subr.bf16.mxu1 %v1913_v37 }
  0x51   :  { %455 = vrot.lane.b32.xlu1 %v450_v38, %s2031_s15  ;;  %453 = vrot.lane.b32.xlu0 %v449_v40, %s2031_s15  ;;  %v1914_v38 = vld [vmem:[%s2821_s3 + $0x188] sm:$0xff]   ;;  %v293_v40 = vmul.f32 %v291_v36, %v2082_v1  ;;  %v1917_v1 = vld [vmem:[%s2821_s3 + $0x1d0] sm:$0xff]  }
  0x52   :  { %1832 = vmatpush3.bf16.msra.mxu1 %v1914_v38 }
  0x53   :  { %1833 = vmatprep.subr.bf16.mxu1 %v1917_v1  ;;  %v369_v1 = vmul.f32 %v2122_v28, %v368_v30 }
  0x55   :  { %487 = vrot.lane.b32.xlu1 %v482_v41, %s2032_s17  ;;  %485 = vrot.lane.b32.xlu0 %v481_v43, %s2032_s17  ;;  %v1916_v41 = vld [vmem:[%s2821_s3 + $0x110] sm:$0xff]   ;;  %v780_v43 = vstv %s2221_s8  ;;  %s2364_s8 = sld [smem:[#allocation2 + $0xe]] }
  0x56   :  { %1812 = vmatpush3.bf16.msra.mxu0 %v1916_v41  ;;  %v782_v46 = vmul.f32 %v2173_v61, %v780_v43  ;;  %v781_v48 = vmul.f32 %v2179_v63, %v780_v43  ;;  %v1936_v43 = vld [vmem:[%s2821_s3 + $0x138] sm:$0xff]  }
  0x59   :  { %519 = vrot.lane.b32.xlu1 %v514_v44, %s2033_s19  ;;  %517 = vrot.lane.b32.xlu0 %v513_v45, %s2033_s19  ;;  %v1918_v44 = vld [vmem:[%s2821_s3 + $0x190] sm:$0xff]   ;;  %v1919_v45 = vld [vmem:[%s2821_s3 + $0x158] sm:$0xff]  }
  0x5a   :  { %1834 = vmatpush3.bf16.msra.mxu1 %v1918_v44  ;;  %1813 = vmatprep.subr.bf16.mxu0 %v1919_v45  ;;  %v400_v44 = vstv %s2321_s22  ;;  %v1937_v45 = vld [vmem:[%s2821_s3 + $0x1f8] sm:$0xff]   ;;  %s2379_s22 = sld [smem:[#allocation2 + $0xf]] }
  0x5b   :  { %1835 = vmatprep.subr.bf16.mxu1 %v1921_v50 }
  0x5d   :  { %551 = vrot.lane.b32.xlu1 %v546_v47, %s2034_s23  ;;  %549 = vrot.lane.b32.xlu0 %v545_v49, %s2034_s23  ;;  %v1920_v47 = vld [vmem:[%s2821_s3 + $0x118] sm:$0xff]   ;;  %v812_v49 = vstv %s2240_s24  ;;  %s2409_s24 = sld [smem:[#allocation2 + $0x13]] }
  0x5e   :  { %1814 = vmatpush3.bf16.msra.mxu0 %v1920_v47 }
  0x61   :  { %66 = vrot.lane.b32.xlu1 %v61_v51, %s2029_s10  ;;  %64 = vrot.lane.b32.xlu0 %v60_v52, %s2029_s10  ;;  %v1922_v52 = vld [vmem:[%s2821_s3 + $0x198] sm:$0xff]  }
  0x62   :  { %1836 = vmatpush3.bf16.msra.mxu1 %v1922_v52 }
  0x65   :  { %583 = vrot.lane.b32.xlu1 %v578_v54, %s2035_s1  ;;  %581 = vrot.lane.b32.xlu0 %v577_v55, %s2035_s1  ;;  %v1923_v54 = vld [vmem:[%s2821_s3 + $0x160] sm:$0xff]   ;;  %v814_v55 = vmul.f32 %v2173_v61, %v812_v49 }
  0x66   :  { %1815 = vmatprep.subr.bf16.mxu0 %v1923_v54  ;;  %v402_v54 = vmul.f32 %v2113_v24, %v400_v44 }
  0x69   :  { %100 = vrot.lane.b32.xlu1 %v95_v56, %s2028_s9  ;;  %98 = vrot.lane.b32.xlu0 %v94_v57, %s2028_s9  ;;  %v1924_v56 = vld [vmem:[%s2821_s3 + $0x120] sm:$0xff]   ;;  %v813_v57 = vmul.f32 %v2179_v63, %v812_v49 }
  0x6a   :  { %1816 = vmatpush3.bf16.msra.mxu0 %v1924_v56  ;;  %v432_v56 = vstv %s2343_s6  ;;  %s2419_s6 = sld [smem:[#allocation2 + $0x14]] }
  0x6d   :  { %133 = vrot.lane.b32.xlu1 %v128_v59, %s2030_s13  ;;  %131 = vrot.lane.b32.xlu0 %v127_v60, %s2030_s13  ;;  %v336_v59 = vstv %s2261_s11  ;;  %v1925_v60 = vld [vmem:[%s2821_s3 + $0x1e0] sm:$0xff]  }
  0x6e   :  { %1837 = vmatprep.subr.bf16.mxu1 %v1925_v60  ;;  %v338_v10 = vmul.f32 %v2113_v24, %v336_v59  ;;  %v337_v13 = vmul.f32 %v2122_v28, %v336_v59 }
  0x71   :  { %627 = vrot.lane.b32.xlu1 %v622_v2, %s2029_s10  ;;  %625 = vrot.lane.b32.xlu0 %v621_v3, %s2029_s10  ;;  %v1926_v2 = vld [vmem:[%s2821_s3 + $0x1a0] sm:$0xff]  }
  0x72   :  { %1838 = vmatpush3.bf16.msra.mxu1 %v1926_v2 }
  0x75   :  { %166 = vrot.lane.b32.xlu1 %v161_v5, %s2031_s15  ;;  %164 = vrot.lane.b32.xlu0 %v160_v6, %s2031_s15  ;;  %v1927_v6 = vld [vmem:[%s2821_s3 + $0x168] sm:$0xff]  }
  0x76   :  { %1817 = vmatprep.subr.bf16.mxu0 %v1927_v6  ;;  %v464_v6 = vstv %s2364_s8  ;;  %s1673_s8 = sld [smem:[#allocation2 + $0x19]] }
  0x79   :  { %659 = vrot.lane.b32.xlu1 %v654_v8, %s2028_s9  ;;  %657 = vrot.lane.b32.xlu0 %v653_v9, %s2028_s9  ;;  %v54_v9 = vmul.f32 %v2077_v0, %v53_v58  ;;  %v1929_v0 = vld [vmem:[%s2821_s3 + $0x1e8] sm:$0xff]  }
  0x7a   :  { %1839 = vmatprep.subr.bf16.mxu1 %v1929_v0  ;;  %v465_v0 = vmul.f32 %v2122_v28, %v464_v6 }
  0x7d   :  { %199 = vrot.lane.b32.xlu1 %v194_v11, %s2032_s17  ;;  %197 = vrot.lane.b32.xlu0 %v193_v12, %s2032_s17  ;;  %v1928_v11 = vld [vmem:[%s2821_s3 + $0x128] sm:$0xff]  }
  0x7e   :  { %1818 = vmatpush3.bf16.msra.mxu0 %v1928_v11 }
  0x7f   :  { %1819 = vmatprep.subr.bf16.mxu0 %v1931_v22 }
  0x81   :  { %691 = vrot.lane.b32.xlu1 %v686_v14, %s2030_s13  ;;  %689 = vrot.lane.b32.xlu0 %v685_v15, %s2030_s13  ;;  %v844_v14 = vstv %s2280_s25  ;;  %s2383_s25 = sld [smem:[#allocation2 + $0x24]] }
  0x82   :  { %v846_v26 = vmul.f32 %v2173_v61, %v844_v14  ;;  %v845_v29 = vmul.f32 %v2179_v63, %v844_v14  ;;  %v466_v14 = vmul.f32 %v2113_v24, %v464_v6 }
  0x85   :  { %232 = vrot.lane.b32.xlu1 %v227_v17, %s2033_s19  ;;  %230 = vrot.lane.b32.xlu0 %v226_v18, %s2033_s19  ;;  %v1930_v18 = vld [vmem:[%s2821_s3 + $0x1a8] sm:$0xff]  }
  0x86   :  { %1840 = vmatpush3.bf16.msra.mxu1 %v1930_v18 }
  0x87   :  { %1841 = vmatprep.subr.bf16.mxu1 %v1933_v31 }
  0x89   :  { %723 = vrot.lane.b32.xlu1 %v718_v20, %s2031_s15  ;;  %721 = vrot.lane.b32.xlu0 %v717_v21, %s2031_s15 }
  0x8d   :  { %265 = vrot.lane.b32.xlu1 %v260_v25, %s2034_s23  ;;  %263 = vrot.lane.b32.xlu0 %v259_v27, %s2034_s23  ;;  %v1932_v27 = vld [vmem:[%s2821_s3 + $0x130] sm:$0xff]  }
  0x8e   :  { %1820 = vmatpush3.bf16.msra.mxu0 %v1932_v27  ;;  %v528_v27 = vstv %s2390_s30 }
  0x8f   :  { %1821 = vmatprep.subr.bf16.mxu0 %v1935_v39  ;;  %v560_v39 = vstv %s2399_s28 }
  0x91   :  { %755 = vrot.lane.b32.xlu1 %v750_v33, %s2032_s17  ;;  %753 = vrot.lane.b32.xlu0 %v749_v35, %s2032_s17  ;;  %v1934_v35 = vld [vmem:[%s2821_s3 + $0x1b0] sm:$0xff]  }
  0x92   :  { %1842 = vmatpush3.bf16.msra.mxu1 %v1934_v35  ;;  %1822 = vmatpush3.bf16.msra.mxu0 %v1936_v43 }
  0x93   :  { %1843 = vmatprep.subr.bf16.mxu1 %v1937_v45 }
  0x95   :  { %298 = vrot.lane.b32.xlu1 %v293_v40, %s2035_s1  ;;  %296 = vrot.lane.b32.xlu0 %v292_v42, %s2035_s1  ;;  %v370_v42 = vmul.f32 %v2113_v24, %v368_v30 }
  0x97   :  { %v116_v51 = vpop.permute.xlu1 %115  ;;  %v83_v53 = vpop.permute.xlu0 %82 }
  0x98   :  { %v119_v3 = vrot.slane %v116_v51, 2  ;;  %v86_v7 = vrot.slane %v83_v53, 2 }
  0x99   :  { %787 = vrot.lane.b32.xlu1 %v782_v46, %s2033_s19  ;;  %785 = vrot.lane.b32.xlu0 %v781_v48, %s2033_s19  ;;  %v1938_v48 = vld [vmem:[%s2821_s3 + $0x1b8] sm:$0xff]  }
  0x9a   :  { %1844 = vmatpush3.bf16.msra.mxu1 %v1938_v48  ;;  %v561_v48 = vmul.f32 %v2122_v28, %v560_v39 }
  0x9b   :  { %v118_v62 = vpop.permute.xlu1 %117  ;;  %v85_v5 = vpop.permute.xlu0 %84 }
  0x9c   :  { %v120_v4 = vrot.slane %v118_v62, 2  ;;  %v87_v8 = vrot.slane %v85_v5, 2  ;;  %v433_v5 = vmul.f32 %v2122_v28, %v432_v56 }
  0x9d   :  { %819 = vrot.lane.b32.xlu1 %v814_v55, %s2034_s23  ;;  %817 = vrot.lane.b32.xlu0 %v813_v57, %s2034_s23  ;;  %v401_v55 = vmul.f32 %v2122_v28, %v400_v44 }
  0x9e   :  { %v121_v12 = vsel %vm70_vm0, %v119_v3, %v120_v4  ;;  %v88_v15 = vsel %vm70_vm0, %v86_v7, %v87_v8  ;;  %v434_v4 = vmul.f32 %v2113_v24, %v432_v56 }
  0x9f   :  { %v151_v16 = vpop.permute.xlu1 %150  ;;  %v122_v17 = vsel %vm105_vm2, %v116_v51, %v121_v12  ;;  %v89_v19 = vsel %vm72_vm1, %v83_v53, %v88_v15  ;;  %v149_v21 = vpop.permute.xlu0 %148  ;;  %v496_v15 = vstv %s2379_s22 }
  0xa0   :  { %v153_v20 = vrot.slane %v151_v16, 2  ;;  %v91_v23 = vadd.f32 %v89_v19, %v54_v9  ;;  %v152_v25 = vrot.slane %v149_v21, 2 }
  0xa1   :  { %343 = vrot.lane.b32.xlu1 %v338_v10, %s2029_s10  ;;  %341 = vrot.lane.b32.xlu0 %v337_v13, %s2029_s10 }
  0xa2   :  { %v124_v32 = vadd.f32 %v122_v17, %v91_v23  ;;  %v154_v33 = vsel %vm70_vm0, %v152_v25, %v153_v20  ;;  %v498_v25 = vmul.f32 %v2113_v24, %v496_v15 }
  0xa3   :  { %v184_v34 = vpop.permute.xlu1 %183  ;;  %v155_v36 = vsel %vm138_vm3, %v149_v21, %v154_v33  ;;  %v182_v38 = vpop.permute.xlu0 %181  ;;  %v330_v21 = vstv %s2383_s25 }
  0xa4   :  { %v186_v37 = vrot.slane %v184_v34, 2  ;;  %v157_v40 = vadd.f32 %v155_v36, %v124_v32  ;;  %v185_v41 = vrot.slane %v182_v38, 2  ;;  %v331_v31 = vmul.f32 %v2122_v28, %v330_v21  ;;  %v1971_v21 = vld [vmem:[%s2818_s0] sm:$0xff] }
  0xa5   :  { %851 = vrot.lane.b32.xlu1 %v846_v26, %s2035_s1  ;;  %849 = vrot.lane.b32.xlu0 %v845_v29, %s2035_s1  ;;  %v497_v26 = vmul.f32 %v2122_v28, %v496_v15 }
  0xa6   :  { %v187_v46 = vsel %vm70_vm0, %v185_v41, %v186_v37  ;;  %v530_v37 = vmul.f32 %v2113_v24, %v528_v27 }
  0xa7   :  { %v217_v47 = vpop.permute.xlu1 %216  ;;  %v188_v49 = vsel %vm171_vm4, %v182_v38, %v187_v46  ;;  %v215_v51 = vpop.permute.xlu0 %214  ;;  %v529_v38 = vmul.f32 %v2122_v28, %v528_v27  ;;  %v796_v27 = vstv %s1673_s8 }
  0xa8   :  { %v219_v50 = vrot.slane %v217_v47, 2  ;;  %v190_v52 = vadd.f32 %v188_v49, %v157_v40  ;;  %v218_v53 = vrot.slane %v215_v51, 2  ;;  %v562_v47 = vmul.f32 %v2113_v24, %v560_v39 }
  0xa9   :  { %375 = vrot.lane.b32.xlu1 %v370_v42, %s2028_s9  ;;  %373 = vrot.lane.b32.xlu0 %v369_v1, %s2028_s9  ;;  %v604_v49 = vstv %s2409_s24  ;;  %s2725_s24 = sld [smem:[#allocation2 + $0x12]] }
  0xaa   :  { %v220_v57 = vsel %vm70_vm0, %v218_v53, %v219_v50  ;;  %v606_v24 = vmul.f32 %v2173_v61, %v604_v49  ;;  %v605_v28 = vmul.f32 %v2179_v63, %v604_v49 }
  0xab   :  { %v250_v58 = vpop.permute.xlu1 %249  ;;  %v221_v59 = vsel %vm204_vm5, %v215_v51, %v220_v57  ;;  %v248_v62 = vpop.permute.xlu0 %247 }
  0xac   :  { %v252_v60 = vrot.slane %v250_v58, 2  ;;  %v223_v2 = vadd.f32 %v221_v59, %v190_v52  ;;  %v251_v3 = vrot.slane %v248_v62, 2  ;;  %v1939_v59 = vld [vmem:[%s2821_s3 + $0x40] sm:$0xff]  }
  0xad   :  { %407 = vrot.lane.b32.xlu1 %v402_v54, %s2030_s13  ;;  %405 = vrot.lane.b32.xlu0 %v401_v55, %s2030_s13  ;;  %v636_v55 = vstv %s2419_s6 }
  0xae   :  { %v253_v7 = vsel %vm70_vm0, %v251_v3, %v252_v60  ;;  %v638_v58 = vmul.f32 %v2173_v61, %v636_v55  ;;  %v637_v60 = vmul.f32 %v2179_v63, %v636_v55  ;;  %1851 = vmatprep.subr.bf16.mxu0 %v1939_v59  ;;  %v1941_v3 = vld [vmem:[%s2821_s3 + $0xc0] sm:$0xff]  }
  0xaf   :  { %v283_v8 = vpop.permute.xlu1 %282  ;;  %v254_v9 = vsel %vm237_vm6, %v248_v62, %v253_v7  ;;  %v281_v11 = vpop.permute.xlu0 %280  ;;  %v668_v62 = vstv %s1665_s14  ;;  %1873 = vmatprep.subr.bf16.mxu1 %v1941_v3  ;;  %v700_v7 = vstv %s1667_s16  ;;  %s2037_s16 = smov [#allocation7]  }
  0xb0   :  { %v285_v10 = vrot.slane %v283_v8, 2  ;;  %v256_v12 = vadd.f32 %v254_v9, %v223_v2  ;;  %v284_v13 = vrot.slane %v281_v11, 2  ;;  %v669_v6 = vmul.f32 %v2179_v63, %v668_v62  ;;  %s1608_s18 = sshll.u32 %s2037_s16, 4  ;;  %s1609_s18 = int_to_ptr.vmem [resolvable:$true] %s1608_s18 }
  0xb1   :  { %439 = vrot.lane.b32.xlu1 %v434_v4, %s2031_s15  ;;  %437 = vrot.lane.b32.xlu0 %v433_v5, %s2031_s15  ;;  %v670_v5 = vmul.f32 %v2173_v61, %v668_v62  ;;  %s1998_s20 = scalar_lea.vmem %s1609_s18, 32  ;;  %p2003_p11 = scmp.lt.s32.totalorder %s1609_s18, %s1609_s18 }
  0xb2   :  { %v286_v16 = vsel %vm70_vm0, %v284_v13, %v285_v10  ;;  %v702_v10 = vmul.f32 %v2173_v61, %v700_v7  ;;  %p1999_p10 = scmp.ne.s32.totalorder %s1609_s18, %s1998_s20  ;;  %p2004_p12 = scmp.lt.s32.totalorder %s1998_s20, %s1998_s20 }
  0xb3   :  { %v316_v17 = vpop.permute.xlu1 %315  ;;  %v287_v18 = vsel %vm270_vm7, %v281_v11, %v286_v16  ;;  %v314_v20 = vpop.permute.xlu0 %313  ;;  %v701_v11 = vmul.f32 %v2179_v63, %v700_v7 }
  0xb4   :  { %v318_v19 = vrot.slane %v316_v17, 2  ;;  %v289_v22 = vadd.f32 %v287_v18, %v256_v12  ;;  %v317_v23 = vrot.slane %v314_v20, 2  ;;  %v732_v12 = vstv %s1669_s12  ;;  %p2005_p13 = por %p2004_p12, %p2003_p11 }
  0xb5   :  { %471 = vrot.lane.b32.xlu1 %v466_v14, %s2032_s17  ;;  %469 = vrot.lane.b32.xlu0 %v465_v0, %s2032_s17  ;;  %v734_v0 = vmul.f32 %v2173_v61, %v732_v12  ;;  %v733_v16 = vmul.f32 %v2179_v63, %v732_v12  ;;  %v764_v17 = vstv %s1671_s21 }
  0xb6   :  { %v319_v29 = vsel %vm70_vm0, %v317_v23, %v318_v19  ;;  %p2006_p0 = pnand %p2005_p13, %p1999_p10 }
  0xb7   :  { %v360_v30 = vpop.permute.xlu1 %359  ;;  %v320_v32 = vsel %vm303_vm8, %v314_v20, %v319_v29  ;;  %v358_v34 = vpop.permute.xlu0 %357 }
  0xb8   :  { %v362_v33 = vrot.slane %v360_v30, 2  ;;  %v322_v35 = vadd.f32 %v320_v32, %v289_v22  ;;  %v361_v36 = vrot.slane %v358_v34, 2 }
  0xb9   :  { %503 = vrot.lane.b32.xlu1 %v498_v25, %s2033_s19  ;;  %501 = vrot.lane.b32.xlu0 %v497_v26, %s2033_s19  ;;  %v766_v25 = vmul.f32 %v2173_v61, %v764_v17  ;;  %v765_v26 = vmul.f32 %v2179_v63, %v764_v17 }
  0xba   :  { %v332_v40 = vadd.f32 %v331_v31, %v322_v35  ;;  %v363_v41 = vsel %vm70_vm0, %v361_v36, %v362_v33  ;;  %v797_v35 = vmul.f32 %v2179_v63, %v796_v27 }
  0xbb   :  { %v392_v42 = vpop.permute.xlu1 %391  ;;  %v364_v43 = vsel %vm72_vm1, %v358_v34, %v363_v41  ;;  %v390_v44 = vpop.permute.xlu0 %389  ;;  %v798_v34 = vmul.f32 %v2173_v61, %v796_v27 }
  0xbc   :  { %v394_v1 = vrot.slane %v392_v42, 2  ;;  %v366_v45 = vadd.f32 %v364_v43, %v332_v40  ;;  %v393_v46 = vrot.slane %v390_v44, 2 }
  0xbd   :  { %535 = vrot.lane.b32.xlu1 %v530_v37, %s2034_s23  ;;  %533 = vrot.lane.b32.xlu0 %v529_v38, %s2034_s23 }
  0xbe   :  { %v395_v50 = vsel %vm70_vm0, %v393_v46, %v394_v1 }
  0xbf   :  { %v2429_v51 = vpop.permute.xlu1 %423  ;;  %v396_v52 = vsel %vm105_vm2, %v390_v44, %v395_v50  ;;  %v2432_v53 = vpop.permute.xlu0 %421 }
  0xc0   :  { %v2434_v54 = vadd.f32 %v396_v52, %v366_v45 }
  0xc1   :  { %567 = vrot.lane.b32.xlu1 %v562_v47, %s2035_s1  ;;  %565 = vrot.lane.b32.xlu0 %v561_v48, %s2035_s1 }
  0xc3   :  { %v2441_v56 = vpop.permute.xlu1 %455  ;;  %v2443_v57 = vpop.permute.xlu0 %453 }
  0xc4   :  { %v457_v17 = vrot.slane %v2443_v57, 2 }
  0xc5   :  { %611 = vrot.lane.b32.xlu1 %v606_v24, %s2029_s10  ;;  %609 = vrot.lane.b32.xlu0 %v605_v28, %s2029_s10  ;;  %s48_s10 = sld [smem:[#allocation2]] }
  0xc7   :  { %v2452_v2 = vpop.permute.xlu1 %487  ;;  %v2457_v4 = vpop.permute.xlu0 %485 }
  0xc9   :  { %643 = vrot.lane.b32.xlu1 %v638_v58, %s2028_s9  ;;  %641 = vrot.lane.b32.xlu0 %v637_v60, %s2028_s9  ;;  %s1675_s9 = sld [smem:[#allocation2 + $0x1a]] }
  0xcb   :  { %v2463_v8 = vpop.permute.xlu1 %519  ;;  %v2465_v9 = vpop.permute.xlu0 %517  ;;  %v49_v15 = vstv %s48_s10 }
  0xcc   :  { %v50_v22 = vmul.f32 %v1971_v21, %v49_v15  ;;  %v425_v15 = vrot.slane %v2432_v53, 2  ;;  %v490_v21 = vrot.slane %v2452_v2, 2 }
  0xcd   :  { %675 = vrot.lane.b32.xlu1 %v670_v5, %s2030_s13  ;;  %673 = vrot.lane.b32.xlu0 %v669_v6, %s2030_s13 }
  0xcf   :  { %v2471_v13 = vpop.permute.xlu1 %551  ;;  %v2473_v14 = vpop.permute.xlu0 %549  ;;  %v828_v36 = vstv %s1675_s9 }
  0xd0   :  { %v830_v41 = vmul.f32 %v2173_v61, %v828_v36  ;;  %v829_v42 = vmul.f32 %v2179_v63, %v828_v36 }
  0xd1   :  { %707 = vrot.lane.b32.xlu1 %v702_v10, %s2031_s15  ;;  %705 = vrot.lane.b32.xlu0 %v701_v11, %s2031_s15  ;;  %s1658_s15 = sld [smem:[#allocation2 + $0x2d]] }
  0xd3   :  { %v67_v18 = vpop.permute.xlu1 %66  ;;  %v65_v20 = vpop.permute.xlu0 %64 }
  0xd4   :  { %v69_v19 = vrot.slane %v67_v18, 2  ;;  %v68_v23 = vrot.slane %v65_v20, 2 }
  0xd5   :  { %739 = vrot.lane.b32.xlu1 %v734_v0, %s2032_s17  ;;  %737 = vrot.lane.b32.xlu0 %v733_v16, %s2032_s17  ;;  %v426_v0 = vrot.slane %v2429_v51, 2  ;;  %v458_v16 = vrot.slane %v2441_v56, 2  ;;  %v522_v51 = vrot.slane %v2463_v8, 2  ;;  %s1677_s17 = sld [smem:[#allocation5 + $0x1]] }
  0xd6   :  { %v71_v29 = vsel %vm70_vm0, %v68_v23, %v69_v19 }
  0xd7   :  { %v2487_v30 = vpop.permute.xlu1 %583  ;;  %v73_v31 = vsel %vm72_vm1, %v65_v20, %v71_v29  ;;  %v2490_v32 = vpop.permute.xlu0 %581  ;;  %v427_v20 = vsel %vm70_vm0, %v425_v15, %v426_v0  ;;  %v459_v23 = vsel %vm70_vm0, %v457_v17, %v458_v16 }
  0xd8   :  { %v75_v33 = vadd.f32 %v73_v31, %v50_v22  ;;  %v489_v22 = vrot.slane %v2457_v4, 2  ;;  %v428_v56 = vsel %vm138_vm3, %v2432_v53, %v427_v20  ;;  %v554_v31 = vrot.slane %v2471_v13, 2 }
  0xd9   :  { %771 = vrot.lane.b32.xlu1 %v766_v25, %s2033_s19  ;;  %769 = vrot.lane.b32.xlu0 %v765_v26, %s2033_s19  ;;  %v521_v25 = vrot.slane %v2465_v9, 2  ;;  %v460_v2 = vsel %vm171_vm4, %v2443_v57, %v459_v23  ;;  %v585_v36 = vrot.slane %v2490_v32, 2  ;;  %s2608_s19 = sld [smem:[#allocation2 + $0x9]] }
  0xda   :  { %v491_v29 = vsel %vm70_vm0, %v489_v22, %v490_v21 }
  0xdb   :  { %v101_v37 = vpop.permute.xlu1 %100  ;;  %v99_v39 = vpop.permute.xlu0 %98  ;;  %v523_v8 = vsel %vm70_vm0, %v521_v25, %v522_v51 }
  0xdc   :  { %v103_v38 = vrot.slane %v101_v37, 2  ;;  %v102_v40 = vrot.slane %v99_v39, 2  ;;  %v492_v37 = vsel %vm204_vm5, %v2457_v4, %v491_v29  ;;  %v524_v57 = vsel %vm237_vm6, %v2465_v9, %v523_v8 }
  0xdd   :  { %803 = vrot.lane.b32.xlu1 %v798_v34, %s2034_s23  ;;  %801 = vrot.lane.b32.xlu0 %v797_v35, %s2034_s23  ;;  %v430_v34 = vadd.f32 %v428_v56, %v2434_v54  ;;  %v586_v35 = vrot.slane %v2487_v30, 2  ;;  %v598_v4 = vstv %s1658_s15 }
  0xde   :  { %v104_v43 = vsel %vm70_vm0, %v102_v40, %v103_v38 }
  0xdf   :  { %v134_v1 = vpop.permute.xlu1 %133  ;;  %v106_v44 = vsel %vm105_vm2, %v99_v39, %v104_v43  ;;  %v132_v46 = vpop.permute.xlu0 %131  ;;  %v462_v38 = vadd.f32 %v460_v2, %v430_v34  ;;  %v587_v40 = vsel %vm70_vm0, %v585_v36, %v586_v35 }
  0xe0   :  { %v136_v45 = vrot.slane %v134_v1, 2  ;;  %v108_v47 = vadd.f32 %v106_v44, %v75_v33  ;;  %v135_v48 = vrot.slane %v132_v46, 2  ;;  %v553_v33 = vrot.slane %v2473_v14, 2 }
  0xe1   :  { %835 = vrot.lane.b32.xlu1 %v830_v41, %s2035_s1  ;;  %833 = vrot.lane.b32.xlu0 %v829_v42, %s2035_s1  ;;  %v494_v54 = vadd.f32 %v492_v37, %v462_v38  ;;  %v2036_v38 = vmov 1983009808  }
  0xe2   :  { %v137_v49 = vsel %vm70_vm0, %v135_v48, %v136_v45  ;;  %v555_v39 = vsel %vm70_vm0, %v553_v33, %v554_v31  ;;  %v588_v45 = vsel %vm303_vm8, %v2490_v32, %v587_v40 }
  0xe3   :  { %v2505_v61 = vpop.permute.xlu1 %627  ;;  %v139_v50 = vsel %vm138_vm3, %v132_v46, %v137_v49  ;;  %v2508_v52 = vpop.permute.xlu0 %625  ;;  %v556_v30 = vsel %vm270_vm7, %v2473_v14, %v555_v39  ;;  %v526_v43 = vadd.f32 %v524_v57, %v494_v54  ;;  %v599_v49 = vmul.f32 %v2179_v63, %v598_v4 }
  0xe4   :  { %v141_v24 = vadd.f32 %v139_v50, %v108_v47  ;;  %v630_v1 = vrot.slane %v2505_v61, 2  ;;  %v629_v44 = vrot.slane %v2508_v52, 2  ;;  %v866_v39 = vunpack.c.l.s4 %v2036_v38 }
  0xe5   :  { %v558_v46 = vadd.f32 %v556_v30, %v526_v43 }
  0xe6   :  { %v867_v4 = vunpack.c.0.s8 %v866_v39 }
  0xe7   :  { %v167_v28 = vpop.permute.xlu1 %166  ;;  %v165_v58 = vpop.permute.xlu0 %164  ;;  %v590_v14 = vadd.f32 %v588_v45, %v558_v46  ;;  %v954_v45 = vstv %s1677_s17 }
  0xe8   :  { %v169_v55 = vrot.slane %v167_v28, 2  ;;  %v168_v59 = vrot.slane %v165_v58, 2 }
  0xea   :  { %v170_v60 = vsel %vm70_vm0, %v168_v59, %v169_v55 }
  0xeb   :  { %v660_v62 = vpop.permute.xlu1 %659  ;;  %v172_v3 = vsel %vm171_vm4, %v165_v58, %v170_v60  ;;  %v2512_v5 = vpop.permute.xlu0 %657 }
  0xec   :  { %v2514_v6 = vadd.f32 %v172_v3, %v141_v24  ;;  %v662_v47 = vrot.slane %v660_v62, 2  ;;  %v661_v9 = vrot.slane %v2512_v5, 2  ;;  %v631_v24 = vsel %vm70_vm0, %v629_v44, %v630_v1 }
  0xed   :  { %v632_v60 = vsel %vm72_vm1, %v2508_v52, %v631_v24  ;;  %v600_v3 = vadd.f32 %v599_v49, %v590_v14 }
  0xee   :  { %v663_v55 = vsel %vm70_vm0, %v661_v9, %v662_v47 }
  0xef   :  { %v2516_v7 = vpop.permute.xlu1 %199  ;;  %v2518_v10 = vpop.permute.xlu0 %197  ;;  %v664_v16 = vsel %vm105_vm2, %v2512_v5, %v663_v55 }
  0xf0   :  { %v202_v49 = vrot.slane %v2516_v7, 2  ;;  %v201_v14 = vrot.slane %v2518_v10, 2 }
  0xf3   :  { %v692_v11 = vpop.permute.xlu1 %691  ;;  %v2520_v12 = vpop.permute.xlu0 %689 }
  0xf4   :  { %v694_v61 = vrot.slane %v692_v11, 2  ;;  %v693_v28 = vrot.slane %v2520_v12, 2  ;;  %v634_v11 = vadd.f32 %v632_v60, %v600_v3  ;;  %v203_v60 = vsel %vm70_vm0, %v201_v14, %v202_v49 }
  0xf6   :  { %v695_v63 = vsel %vm70_vm0, %v693_v28, %v694_v61  ;;  %v666_v52 = vadd.f32 %v664_v16, %v634_v11 }
  0xf7   :  { %v2526_v18 = vpop.permute.xlu1 %232  ;;  %v2528_v19 = vpop.permute.xlu0 %230  ;;  %v696_v23 = vsel %vm138_vm3, %v2520_v12, %v695_v63 }
  0xf8   :  { %v698_v31 = vadd.f32 %v696_v23, %v666_v52 }
  0xfb   :  { %v724_v26 = vpop.permute.xlu1 %723  ;;  %v722_v27 = vpop.permute.xlu0 %721 }
  0xfc   :  { %v726_v58 = vrot.slane %v724_v26, 2  ;;  %v725_v32 = vrot.slane %v722_v27, 2 }
  0xfe   :  { %v727_v17 = vsel %vm70_vm0, %v725_v32, %v726_v58  ;;  %v235_v58 = vrot.slane %v2526_v18, 2  ;;  %v234_v32 = vrot.slane %v2528_v19, 2 }
  0xff   :  { %v2547_v53 = vpop.permute.xlu1 %265  ;;  %v2551_v13 = vpop.permute.xlu0 %263  ;;  %v728_v29 = vsel %vm171_vm4, %v722_v27, %v727_v17  ;;  %v868_v27 = vlaneseq }
 0x100   :  { %v730_v8 = vadd.f32 %v728_v29, %v698_v31  ;;  %v268_v7 = vrot.slane %v2547_v53, 2  ;;  %v236_v18 = vsel %vm70_vm0, %v234_v32, %v235_v58  ;;  %v205_v53 = vsel %vm204_vm5, %v2518_v10, %v203_v60  ;;  %v1943_v10 = vld [vmem:[%s2821_s3 + $0x48] sm:$0xff]   ;;  %v1950_v58 = vld [vmem:[%s2821_s3 + $0x90] sm:$0xff]  }
 0x101   :  { %v869_v44 = vshrl.u32 %v868_v27, 7 }
 0x103   :  { %v756_v41 = vpop.permute.xlu1 %755  ;;  %v754_v42 = vpop.permute.xlu0 %753  ;;  %v2601_v28 = vsub.s32 %v867_v4, %v869_v44  ;;  %v1948_v44 = vld [vmem:[%s2821_s3 + $0x10] sm:$0xff]  }
 0x104   :  { %v758_v0 = vrot.slane %v756_v41, 2  ;;  %v757_v15 = vrot.slane %v754_v42, 2 }
 0x106   :  { %v759_v25 = vsel %vm70_vm0, %v757_v15, %v758_v0 }
 0x107   :  { %v2564_v48 = vpop.permute.xlu1 %298  ;;  %v2567_v50 = vpop.permute.xlu0 %296  ;;  %v760_v2 = vsel %vm204_vm5, %v754_v42, %v759_v25 }
 0x108   :  { %v762_v36 = vadd.f32 %v760_v2, %v730_v8  ;;  %v301_v16 = vrot.slane %v2564_v48, 2  ;;  %v300_v11 = vrot.slane %v2567_v50, 2  ;;  %v238_v48 = vsel %vm237_vm6, %v2528_v19, %v236_v18  ;;  %v1942_v19 = vld [vmem:[%s2821_s3 + $0x80] sm:$0xff]  }
 0x109   :  { %v1955_v18 = vld [vmem:[%s2821_s3 + $0x60] sm:$0xff]  }
 0x10a   :  { %v302_v29 = vsel %vm70_vm0, %v300_v11, %v301_v16 }
 0x10b   :  { %v788_v59 = vpop.permute.xlu1 %787  ;;  %v786_v62 = vpop.permute.xlu0 %785  ;;  %v304_v38 = vsel %vm303_vm8, %v2567_v50, %v302_v29  ;;  %v1946_v50 = vld [vmem:[%s2821_s3 + $0x88] sm:$0xff]  }
 0x10c   :  { %v790_v20 = vrot.slane %v788_v59, 2  ;;  %v789_v21 = vrot.slane %v786_v62, 2 }
 0x10e   :  { %v791_v5 = vsel %vm70_vm0, %v789_v21, %v790_v20 }
 0x10f   :  { %v820_v22 = vpop.permute.xlu1 %819  ;;  %v818_v51 = vpop.permute.xlu0 %817  ;;  %v792_v35 = vsel %vm237_vm6, %v786_v62, %v791_v5  ;;  %v267_v62 = vrot.slane %v2551_v13, 2  ;;  %v326_v5 = vstv %s2608_s19 }
 0x110   :  { %v822_v26 = vrot.slane %v820_v22, 2  ;;  %v821_v56 = vrot.slane %v818_v51, 2  ;;  %v794_v41 = vadd.f32 %v792_v35, %v762_v36 }
 0x111   :  { %v269_v21 = vsel %vm70_vm0, %v267_v62, %v268_v7 }
 0x112   :  { %v823_v12 = vsel %vm70_vm0, %v821_v56, %v822_v26  ;;  %v207_v56 = vadd.f32 %v205_v53, %v2514_v6  ;;  %v271_v31 = vsel %vm270_vm7, %v2551_v13, %v269_v21  ;;  %v1944_v13 = vld [vmem:[%s2821_s3 + $0x8] sm:$0xff]  }
 0x113   :  { %v2583_v33 = vpop.permute.xlu1 %343  ;;  %v2586_v34 = vpop.permute.xlu0 %341  ;;  %v824_v57 = vsel %vm270_vm7, %v818_v51, %v823_v12  ;;  %v1940_v51 = vld [vmem:[%s2821_s3] sm:$0xff]  }
 0x114   :  { %v826_v42 = vadd.f32 %v824_v57, %v794_v41  ;;  %v240_v8 = vadd.f32 %v238_v48, %v207_v56  ;;  %v346_v12 = vrot.slane %v2583_v33, 2  ;;  %v345_v35 = vrot.slane %v2586_v34, 2  ;;  %v1947_v33 = vld [vmem:[%s2821_s3 + $0x50] sm:$0xff]   ;;  %v1959_v56 = vld [vmem:[%s2821_s3 + $0x68] sm:$0xff]  }
 0x116   :  { %v273_v27 = vadd.f32 %v271_v31, %v240_v8 }
 0x117   :  { %v852_v37 = vpop.permute.xlu1 %851  ;;  %v850_v40 = vpop.permute.xlu0 %849 }
 0x118   :  { %v854_v54 = vrot.slane %v852_v37, 2  ;;  %v853_v30 = vrot.slane %v850_v40, 2  ;;  %v1945_v37 = vld [vmem:[%s2821_s3 + $0xc8] sm:$0xff]  }
 0x11a   :  { %v855_v43 = vsel %vm70_vm0, %v853_v30, %v854_v54  ;;  %v306_v30 = vadd.f32 %v304_v38, %v273_v27 }
 0x11b   :  { %v2592_v1 = vpop.permute.xlu1 %375  ;;  %v856_v46 = vsel %vm303_vm8, %v850_v40, %v855_v43  ;;  %v2595_v47 = vpop.permute.xlu0 %373  ;;  %v1972_v40 = vld [vmem:[%s2818_s0 + $0xa] sm:$0xff] }
 0x11c   :  { %v858_v9 = vadd.f32 %v856_v46, %v826_v42  ;;  %v378_v57 = vrot.slane %v2592_v1, 2  ;;  %v377_v54 = vrot.slane %v2595_v47, 2  ;;  %v327_v41 = vmul.f32 %v1972_v40, %v326_v5  ;;  %v1964_v40 = vld [vmem:[%s2821_s3 + $0x30] sm:$0xff]  }
 0x11d   :  { %v347_v42 = vsel %vm70_vm0, %v345_v35, %v346_v12 }
 0x11e   :  { %v955_v24 = vadd.f32 %v954_v45, %v858_v9  ;;  %v1949_v45 = vld [vmem:[%s2821_s3 + $0xd0] sm:$0xff]   ;;  %v1951_v9 = vld [vmem:[%s2821_s3 + $0x58] sm:$0xff]   ;;  %v379_v49 = vsel %vm70_vm0, %v377_v54, %v378_v57  ;;  %v328_v32 = vadd.f32 %v327_v41, %v306_v30  ;;  %v1962_v57 = vld [vmem:[%s2821_s3 + $0xa8] sm:$0xff]   ;;  %v594_v30 = vstv %s2725_s24 }
 0x11f   :  { %v2599_v61 = vpop.permute.xlu1 %407  ;;  %v2603_v55 = vpop.permute.xlu0 %405  ;;  %v1965_v41 = vld [vmem:[%s2821_s3 + $0xf0] sm:$0xff]  }
 0x120   :  { %v956_v59 = vmax.f32 %v955_v24, 0.0  ;;  %v410_v43 = vrot.slane %v2599_v61, 2  ;;  %v409_v1 = vrot.slane %v2603_v55, 2  ;;  %v348_v61 = vsel %vm72_vm1, %v2586_v34, %v347_v42  ;;  %v1953_v34 = vld [vmem:[%s2821_s3 + $0xd8] sm:$0xff]  }
 0x121   :  { %v350_v16 = vadd.f32 %v348_v61, %v328_v32  ;;  %v1969_v32 = vld [vmem:[%s2821_s3 + $0xf8] sm:$0xff]  }
 0x122   :  { %v965_v63 = vrot.slane %v956_v59, %v2601_v28  ;;  %v958_v0 = vcombine.high %v956_v59, %v956_v59  ;;  %v411_v59 = vsel %vm70_vm0, %v409_v1, %v410_v43  ;;  %v1967_v43 = vld [vmem:[%s2821_s3 + $0x78] sm:$0xff]  }
 0x123   :  { %v2612_v3 = vpop.permute.xlu1 %439  ;;  %v2615_v15 = vpop.permute.xlu0 %437 }
 0x124   :  { %v973_v17 = vcombine.high %v965_v63, %v965_v63  ;;  %v972_v20 = vrot.slane %v958_v0, %v2601_v28  ;;  %v979_v25 = vpack.c.bf16 %v965_v63, %v965_v63  ;;  %v442_v14 = vrot.slane %v2612_v3, 2  ;;  %v1952_v3 = vld [vmem:[%s2821_s3 + $0x18] sm:$0xff]  }
 0x125   :  { %v441_v24 = vrot.slane %v2615_v15, 2  ;;  %v380_v63 = vsel %vm105_vm2, %v2595_v47, %v379_v49  ;;  %v1954_v47 = vld [vmem:[%s2821_s3 + $0x98] sm:$0xff]  }
 0x126   :  { %v980_v23 = vpack.c.bf16 %v973_v17, %v973_v17  ;;  %v974_v26 = vcombine.high %v972_v20, %v972_v20  ;;  %v981_v6 = vpack.c.bf16 %v972_v20, %v972_v20  ;;  %v412_v20 = vsel %vm138_vm3, %v2603_v55, %v411_v59  ;;  %v1957_v55 = vld [vmem:[%s2821_s3 + $0xe0] sm:$0xff]  }
 0x127   :  { %v2624_v22 = vpop.permute.xlu1 %471  ;;  %v2631_v52 = vpop.permute.xlu0 %469  ;;  %v443_v11 = vsel %vm70_vm0, %v441_v24, %v442_v14  ;;  %v382_v21 = vadd.f32 %v380_v63, %v350_v16 }
 0x128   :  { %1272 = vmatprep.mubr.bf16.mxu0 %v980_v23  ;;  %v982_v2 = vpack.c.bf16 %v974_v26, %v974_v26  ;;  %v474_v60 = vrot.slane %v2624_v22, 2  ;;  %v473_v7 = vrot.slane %v2631_v52, 2  ;;  %v444_v26 = vsel %vm171_vm4, %v2615_v15, %v443_v11  ;;  %v1958_v15 = vld [vmem:[%s2821_s3 + $0xa0] sm:$0xff]  }
 0x129   :  { %1273 = vmatmul.mubr.bf16.vlgmr.msra.gmra.mrb[0].mxu0 %v979_v25  ;;  %v1956_v25 = vld [vmem:[%s2821_s3 + $0x20] sm:$0xff]   ;;  %v414_v29 = vadd.f32 %v412_v20, %v382_v21 }
 0x12a   :  { %1852 = vmatpush3.bf16.msra.mxu0 %v1940_v51  ;;  %1312 = vmatprep.mubr.bf16.mxu1 %v982_v2  ;;  %v475_v22 = vsel %vm70_vm0, %v473_v7, %v474_v60 }
 0x12b   :  { %v2646_v36 = vpop.permute.xlu1 %503  ;;  %v2656_v39 = vpop.permute.xlu0 %501  ;;  %1853 = vmatprep.subr.bf16.mxu0 %v1943_v10  ;;  %1313 = vmatmul.mubr.bf16.vlgmr.msra.gmra.mrb[0].mxu1 %v981_v6  ;;  %v446_v8 = vadd.f32 %v444_v26, %v414_v29  ;;  %v1961_v6 = vld [vmem:[%s2821_s3 + $0xe8] sm:$0xff]  }
 0x12c   :  { %1874 = vmatpush3.bf16.msra.mxu1 %v1942_v19  ;;  %v506_v17 = vrot.slane %v2646_v36, 2  ;;  %v505_v53 = vrot.slane %v2656_v39, 2  ;;  %v476_v19 = vsel %vm204_vm5, %v2631_v52, %v475_v22  ;;  %v1960_v36 = vld [vmem:[%s2821_s3 + $0x28] sm:$0xff]  }
 0x12d   :  { %1875 = vmatprep.subr.bf16.mxu1 %v1945_v37  ;;  %v1963_v37 = vld [vmem:[%s2821_s3 + $0x70] sm:$0xff]   ;;  %v478_v38 = vadd.f32 %v476_v19, %v446_v8 }
 0x12e   :  { %1854 = vmatpush3.bf16.msra.mxu0 %v1944_v13  ;;  %v507_v31 = vsel %vm70_vm0, %v505_v53, %v506_v17 }
 0x12f   :  { %v536_v4 = vpop.permute.xlu1 %535  ;;  %v2678_v46 = vpop.permute.xlu0 %533  ;;  %1855 = vmatprep.subr.bf16.mxu0 %v1947_v33  ;;  %v508_v52 = vsel %vm237_vm6, %v2656_v39, %v507_v31 }
 0x130   :  { %1876 = vmatpush3.bf16.msra.mxu1 %v1946_v50  ;;  %v538_v23 = vrot.slane %v536_v4, 2  ;;  %v537_v51 = vrot.slane %v2678_v46, 2  ;;  %v510_v54 = vadd.f32 %v508_v52, %v478_v38 }
 0x131   :  { %1877 = vmatprep.subr.bf16.mxu1 %v1949_v45  ;;  %v1966_v45 = vld [vmem:[%s2821_s3 + $0xb0] sm:$0xff]  }
 0x132   :  { %1856 = vmatpush3.bf16.msra.mxu0 %v1948_v44  ;;  %v539_v12 = vsel %vm70_vm0, %v537_v51, %v538_v23 }
 0x133   :  { %v568_v62 = vpop.permute.xlu1 %567  ;;  %v566_v0 = vpop.permute.xlu0 %565  ;;  %1857 = vmatprep.subr.bf16.mxu0 %v1951_v9  ;;  %v540_v27 = vsel %vm270_vm7, %v2678_v46, %v539_v12  ;;  %v1973_v9 = vld [vmem:[%s2818_s0 + $0x14] sm:$0xff] }
 0x134   :  { %1878 = vmatpush3.bf16.msra.mxu1 %v1950_v58  ;;  %v570_v5 = vrot.slane %v568_v62, 2  ;;  %v569_v2 = vrot.slane %v566_v0, 2  ;;  %v542_v1 = vadd.f32 %v540_v27, %v510_v54  ;;  %v595_v49 = vmul.f32 %v1973_v9, %v594_v30  ;;  %v1968_v58 = vld [vmem:[%s2821_s3 + $0x38] sm:$0xff]  }
 0x135   :  { %1879 = vmatprep.subr.bf16.mxu1 %v1953_v34 }
 0x136   :  { %1858 = vmatpush3.bf16.msra.mxu0 %v1952_v3  ;;  %v571_v33 = vsel %vm70_vm0, %v569_v2, %v570_v5  ;;  %v1970_v3 = vld [vmem:[%s2821_s3 + $0xb8] sm:$0xff]   ;;  %s859_s3 = sld [smem:[#allocation5]] }
 0x137   :  { %v2715_v48 = vpop.permute.xlu1 %611  ;;  %v2727_v10 = vpop.permute.xlu0 %609  ;;  %1859 = vmatprep.subr.bf16.mxu0 %v1955_v18  ;;  %v572_v50 = vsel %vm303_vm8, %v566_v0, %v571_v33 }
 0x138   :  { %1880 = vmatpush3.bf16.msra.mxu1 %v1954_v47  ;;  %v614_v4 = vrot.slane %v2715_v48, 2  ;;  %v613_v44 = vrot.slane %v2727_v10, 2  ;;  %v574_v46 = vadd.f32 %v572_v50, %v542_v1 }
 0x139   :  { %1881 = vmatprep.subr.bf16.mxu1 %v1957_v55 }
 0x13a   :  { %1860 = vmatpush3.bf16.msra.mxu0 %v1956_v25  ;;  %v615_v60 = vsel %vm70_vm0, %v613_v44, %v614_v4  ;;  %v596_v34 = vadd.f32 %v595_v49, %v574_v46 }
 0x13b   :  { %v644_v35 = vpop.permute.xlu1 %643  ;;  %v642_v13 = vpop.permute.xlu0 %641  ;;  %1861 = vmatprep.subr.bf16.mxu0 %v1959_v56  ;;  %v616_v11 = vsel %vm72_vm1, %v2727_v10, %v615_v60 }
 0x13c   :  { %1882 = vmatpush3.bf16.msra.mxu1 %v1958_v15  ;;  %v646_v14 = vrot.slane %v644_v35, 2  ;;  %v645_v24 = vrot.slane %v642_v13, 2  ;;  %v618_v22 = vadd.f32 %v616_v11, %v596_v34 }
 0x13d   :  { %1883 = vmatprep.subr.bf16.mxu1 %v1961_v6 }
 0x13e   :  { %1862 = vmatpush3.bf16.msra.mxu0 %v1960_v36  ;;  %v647_v63 = vsel %vm70_vm0, %v645_v24, %v646_v14 }
 0x13f   :  { %v676_v39 = vpop.permute.xlu1 %675  ;;  %v674_v42 = vpop.permute.xlu0 %673  ;;  %1863 = vmatprep.subr.bf16.mxu0 %v1963_v37  ;;  %v648_v21 = vsel %vm105_vm2, %v642_v13, %v647_v63 }
 0x140   :  { %1884 = vmatpush3.bf16.msra.mxu1 %v1962_v57  ;;  %v678_v7 = vrot.slane %v676_v39, 2  ;;  %v677_v62 = vrot.slane %v674_v42, 2  ;;  %v650_v26 = vadd.f32 %v648_v21, %v618_v22 }
 0x141   :  { %1885 = vmatprep.subr.bf16.mxu1 %v1965_v41 }
 0x142   :  { %1864 = vmatpush3.bf16.msra.mxu0 %v1964_v40  ;;  %v679_v53 = vsel %vm70_vm0, %v677_v62, %v678_v7  ;;  %v860_v40 = vstv %s859_s3 }
 0x143   :  { %v708_v61 = vpop.permute.xlu1 %707  ;;  %v706_v59 = vpop.permute.xlu0 %705  ;;  %1865 = vmatprep.subr.bf16.mxu0 %v1967_v43  ;;  %v680_v48 = vsel %vm138_vm3, %v674_v42, %v679_v53 }
 0x144   :  { %1886 = vmatpush3.bf16.msra.mxu1 %v1966_v45  ;;  %v710_v0 = vrot.slane %v708_v61, 2  ;;  %v709_v18 = vrot.slane %v706_v59, 2  ;;  %v682_v31 = vadd.f32 %v680_v48, %v650_v26 }
 0x145   :  { %1887 = vmatprep.subr.bf16.mxu1 %v1969_v32 }
 0x146   :  { %1866 = vmatpush3.bf16.msra.mxu0 %v1968_v58  ;;  %v711_v23 = vsel %vm70_vm0, %v709_v18, %v710_v0 }
 0x147   :  { %v740_v16 = vpop.permute.xlu1 %739  ;;  %v738_v17 = vpop.permute.xlu0 %737  ;;  %v712_v29 = vsel %vm171_vm4, %v706_v59, %v711_v23  ;;  %v1806_v23 = vld [vmem:[%s2822_s4] ss:$0 sm:$0xff] }
 0x148   :  { %v742_v20 = vrot.slane %v740_v16, 2  ;;  %v741_v47 = vrot.slane %v738_v17, 2  ;;  %1888 = vmatpush3.bf16.msra.mxu1 %v1970_v3  ;;  %v714_v12 = vadd.f32 %v712_v29, %v682_v31 }
 0x14a   :  { %v743_v56 = vsel %vm70_vm0, %v741_v47, %v742_v20 }
 0x14b   :  { %v772_v51 = vpop.permute.xlu1 %771  ;;  %v770_v55 = vpop.permute.xlu0 %769  ;;  %v744_v19 = vsel %vm204_vm5, %v738_v17, %v743_v56 }
 0x14c   :  { %v774_v25 = vrot.slane %v772_v51, 2  ;;  %v773_v10 = vrot.slane %v770_v55, 2  ;;  %v746_v6 = vadd.f32 %v744_v19, %v714_v12 }
 0x14e   :  { %v775_v5 = vsel %vm70_vm0, %v773_v10, %v774_v25 }
 0x14f   :  { %v804_v2 = vpop.permute.xlu1 %803  ;;  %v802_v8 = vpop.permute.xlu0 %801  ;;  %v776_v36 = vsel %vm237_vm6, %v770_v55, %v775_v5 }
 0x150   :  { %v806_v15 = vrot.slane %v804_v2, 2  ;;  %v805_v35 = vrot.slane %v802_v8, 2  ;;  %v778_v27 = vadd.f32 %v776_v36, %v746_v6 }
 0x152   :  { %v807_v52 = vsel %vm70_vm0, %v805_v35, %v806_v15 }
 0x153   :  { %v836_v13 = vpop.permute.xlu1 %835  ;;  %v808_v37 = vsel %vm270_vm7, %v802_v8, %v807_v52  ;;  %v834_v33 = vpop.permute.xlu0 %833 }
 0x154   :  { %v838_v38 = vrot.slane %v836_v13, 2  ;;  %v837_v57 = vrot.slane %v834_v33, 2  ;;  %v810_v54 = vadd.f32 %v808_v37, %v778_v27 }
 0x156   :  { %v839_v39 = vsel %vm70_vm0, %v837_v57, %v838_v38 }
 0x157   :  { %v840_v41 = vsel %vm303_vm8, %v834_v33, %v839_v39 }
 0x158   :  { %v842_v50 = vadd.f32 %v840_v41, %v810_v54 }
 0x15a   :  { %v861_v30 = vadd.f32 %v860_v40, %v842_v50 }
 0x15c   :  { %v862_v42 = vmax.f32 %v861_v30, 0.0 }
 0x15e   :  { %v864_v43 = vcombine.high %v862_v42, %v862_v42  ;;  %v871_v1 = vrot.slane %v862_v42, %v2601_v28 }
 0x160   :  { %v879_v4 = vcombine.high %v871_v1, %v871_v1  ;;  %v878_v44 = vrot.slane %v864_v43, %v2601_v28  ;;  %v885_v9 = vpack.c.bf16 %v871_v1, %v871_v1 }
 0x162   :  { %v886_v45 = vpack.c.bf16 %v879_v4, %v879_v4  ;;  %v880_v46 = vcombine.high %v878_v44, %v878_v44  ;;  %v887_v14 = vpack.c.bf16 %v878_v44, %v878_v44 }
 0x164   :  { %1544 = vmatprep.mubr.bf16.mxu0 %v886_v45  ;;  %v888_v49 = vpack.c.bf16 %v880_v46, %v880_v46 }
 0x165   :  { %1545 = vmatmul.mubr.bf16.vlgmr.msra.gmra.mrb[4].mxu0 %v885_v9 }
 0x166   :  { %1584 = vmatprep.mubr.bf16.mxu1 %v888_v49 }
 0x167   :  { %1585 = vmatmul.mubr.bf16.vlgmr.msra.gmra.mrb[4].mxu1 %v887_v14 }
 0x1fc   :  { %v1823_v24 = vpop.f32.mrb[0].mxu0 }
 0x1fd   :  { %v1824_v61 = vpop.f32.mrb[1].mxu0 }
 0x1fe   :  { %v1825_v58 = vadd.f32 %v1824_v61, %v1823_v24  ;;  %v1826_v32 = vpop.f32.mrb[2].mxu0  ;;  %v1845_v59 = vpop.f32.mrb[0].mxu1 }
 0x1ff   :  { %v1827_v60 = vpop.f32.mrb[3].mxu0  ;;  %v1846_v7 = vpop.f32.mrb[1].mxu1 }
 0x200   :  { %v1847_v62 = vadd.f32 %v1846_v7, %v1845_v59  ;;  %v1848_v3 = vpop.f32.mrb[2].mxu1 }
 0x201   :  { %v1849_v34 = vpop.f32.mrb[3].mxu1 }
 0x202   :  { %v1315_v28 = vadd.f32 %v1847_v62, %v1825_v58 }
 0x238   :  { %v1867_v63 = vpop.f32.mrb[4].mxu0 }
 0x239   :  { %v1868_v0 = vpop.f32.mrb[5].mxu0 }
 0x23a   :  { %v1869_v18 = vadd.f32 %v1868_v0, %v1867_v63  ;;  %v1870_v16 = vpop.f32.mrb[6].mxu0  ;;  %v1889_v11 = vpop.f32.mrb[4].mxu1 }
 0x23b   :  { %v1871_v17 = vpop.f32.mrb[7].mxu0  ;;  %v1890_v53 = vpop.f32.mrb[5].mxu1 }
 0x23c   :  { %v1547_v20 = vadd.f32 %v1869_v18, %v1315_v28  ;;  %v1891_v47 = vadd.f32 %v1890_v53, %v1889_v11  ;;  %v1892_v21 = vpop.f32.mrb[6].mxu1 }
 0x23d   :  { %v1893_v22 = vpop.f32.mrb[7].mxu1 }
 0x23e   :  { %v1587_v51 = vadd.f32 %v1891_v47, %v1547_v20 }
 0x240   :  { %v1599_v48 = vadd.f32 %v1806_v23, %v1587_v51 }
 0x242   :  { %v1600_v25 = vmax.f32 %v1599_v48, 0.0 }
 0x244   :  { %1601 = vst [vmem:[#allocation7] sm:$0x3] %v1600_v25 }
 0x245   :  { %2009 = shalt.err (!%p2006_p0)
}
 0x246   :  { %s2010_s11 = scalar_lea.hbm %s2823_s5, 32 }
 0x247   :  { %p2011_p1 = scmp.ne.s32.totalorder %s2823_s5, %s2010_s11  ;;  %p2014_p2 = scmp.lt.u32.totalorder %s2010_s11, %s2823_s5 }
 0x249   :  { %p2016_p3 = pnand %p2014_p2, %p2011_p1 }
 0x24b   :  { %2019 = shalt.err (!%p2016_p3)
}
 0x24c   :  { %1611 = dma.vmem_to_hbm [thread:$0]  %s1609_s18, 32, %s2823_s5, [#allocation3]  }
 0x24d   :  { %2024 = dma.done.wait [#allocation3], 32  }
 0x24e   :  { %2025 = vsyncadd [#allocation3], 4294967264 }
 0x24f   :  { %1615 = vsyncpa [#allocation3], 1 }
 0x250   :  { %1616 = vsyncpa [#allocation4], 1 }
 0x251   :  { %1617 = vsyncpa [#allocation6], 1 }

</bundles_post_ra>
